<compile_context>
chip_gen: v6e
topology: v6e:2x2x1
jax: 0.10.0
libtpu: 0.0.40
codegen_flags: <defaults>
</compile_context>

<pallas_src>
import functools

import jax
import jax.numpy as jnp
import numpy as np
from jax import lax
from jax.experimental import pallas as pl
from jax.experimental.pallas import tpu as pltpu


def _pyconv_level_kernel(x_ref, w_ref, o_ref, p_ref, *, K, H, W, off):
    """One batch element of one pyramid level.

    x_ref : (1, Hpm, Wpm, C)  shared padded NHWC input (padding = max level pad)
    w_ref : (K*K*C, Np)       block-diagonal weights, Np = Cout padded to 128
    o_ref : (1, H*W, Np)      lane-dense output slab
    p_ref : (H*W, K*K*C)      VMEM im2col scratch
    """
    C = x_ref.shape[-1]
    # im2col: one pure copy per tap (no per-tap matmul, no per-tap output store).
    for ky in range(K):
        for kx in range(K):
            tap = ky * K + kx
            win = x_ref[0, off + ky:off + ky + H, off + kx:off + kx + W, :]
            p_ref[:, tap * C:(tap + 1) * C] = win.reshape(H * W, C)
    # Single big MXU matmul: (H*W, K*K*C) @ (K*K*C, Np), f32 accumulation.
    acc = jnp.dot(p_ref[...], w_ref[...], preferred_element_type=jnp.float32)
    o_ref[0] = acc.astype(o_ref.dtype)


def pyconv_level(x_pad, w_big, *, K, H, W, off):
    """One pyramid level: grouped 'same' conv, stride=1, dilation=1, no bias.

    x_pad : (B, Hpm, Wpm, C)  NHWC input padded with max_pad on both spatial dims
    w_big : (K*K*C, Np)       block-diagonal flattened weights (Np mult. of 128)
    off   : max_pad - K//2    spatial offset of this level inside x_pad
    returns (B, H*W, Np) float32
    """
    B, Hpm, Wpm, C = x_pad.shape
    KKC, Np = w_big.shape
    kernel = functools.partial(_pyconv_level_kernel, K=K, H=H, W=W, off=off)
    return pl.pallas_call(
        kernel,
        out_shape=jax.ShapeDtypeStruct((B, H * W, Np), jnp.float32),
        grid_spec=pltpu.PrefetchScalarGridSpec(
            num_scalar_prefetch=0,
            grid=(B,),
            in_specs=[
                pl.BlockSpec((1, Hpm, Wpm, C), lambda b: (b, 0, 0, 0)),
                # constant index_map -> weights stay resident across the batch
                pl.BlockSpec((KKC, Np), lambda b: (0, 0)),
            ],
            out_specs=pl.BlockSpec((1, H * W, Np), lambda b: (b, 0, 0)),
            scratch_shapes=[pltpu.VMEM((H * W, KKC), x_pad.dtype)],
        ),
        compiler_params=pltpu.CompilerParams(
            dimension_semantics=("parallel",)),
    )(x_pad, w_big)


class PyConv2dPallas:
    """PyConv2d: one grouped conv per pyramid level, outputs concatenated on C."""

    def __init__(self, in_channels, out_channels, pyconv_kernels, pyconv_groups,
                 compute_dtype=jnp.float32, key=jax.random.PRNGKey(0)):
        assert len(out_channels) == len(pyconv_kernels) == len(pyconv_groups)
        self.in_channels = in_channels
        self.out_channels = list(out_channels)
        self.kernels = list(pyconv_kernels)
        self.groups = list(pyconv_groups)
        self.compute_dtype = compute_dtype   # set jnp.bfloat16 on v6e/v7x
        self.weights = []   # dense per level: (G, K, K, Cin_g, Og)  (reference)
        self.w_big = []     # block-diag per level: (K*K*C, Np)      (kernel)
        keys = jax.random.split(key, len(out_channels))
        for i, (oc, k, g) in enumerate(zip(out_channels, pyconv_kernels,
                                           pyconv_groups)):
            assert k % 2 == 1, "same-padding (k//2) requires odd kernel sizes"
            assert in_channels % g == 0 and oc % g == 0
            cin_g = in_channels // g
            og = oc // g
            scale = 1.0 / np.sqrt(cin_g * k * k)
            w = scale * jax.random.normal(keys[i], (g, k, k, cin_g, og),
                                          jnp.float32)
            self.weights.append(w)
            # Block-diagonal weight: row index = tap*C + c_full, column = out ch.
            n_pad = ((oc + 127) // 128) * 128            # lane-dense output
            wb = jnp.zeros((k * k, in_channels, n_pad), jnp.float32)
            for gg in range(g):
                wb = wb.at[:, gg * cin_g:(gg + 1) * cin_g,
                           gg * og:(gg + 1) * og].set(
                               w[gg].reshape(k * k, cin_g, og))
            self.w_big.append(wb.reshape(k * k * in_channels, n_pad))

    def __call__(self, x_nchw):
        B, C, H, W = x_nchw.shape
        assert C == self.in_channels
        maxp = max(k // 2 for k in self.kernels)
        # One NCHW->NHWC transpose + one spatial pad, shared by all levels.
        x = jnp.transpose(x_nchw, (0, 2, 3, 1)).astype(self.compute_dtype)
        x = jnp.pad(x, ((0, 0), (maxp, maxp), (maxp, maxp), (0, 0)))
        outs = []
        for wb, k, oc in zip(self.w_big, self.kernels, self.out_channels):
            y = pyconv_level(x, wb.astype(self.compute_dtype),
                             K=k, H=H, W=W, off=maxp - k // 2)
            outs.append(y[:, :, :oc])                  # drop lane padding
        y = jnp.concatenate(outs, axis=-1)             # (B, H*W, sum C) ch-last
        # Single transpose back to NCHW, after the concat (torch channel order).
        y = jnp.transpose(y, (0, 2, 1)).reshape(B, sum(self.out_channels), H, W)
        return y.astype(x_nchw.dtype)

    # pure-JAX reference (lax grouped conv) for correctness checking
    def reference(self, x_nchw):
        outs = []
        for w, k, g in zip(self.weights, self.kernels, self.groups):
            G, K, _, cin_g, og = w.shape
            w_oihw = w.transpose(0, 4, 3, 1, 2).reshape(G * og, cin_g, K, K)
            p = K // 2
            o = lax.conv_general_dilated(
                x_nchw, w_oihw, window_strides=(1, 1),
                padding=[(p, p), (p, p)],
                dimension_numbers=("NCHW", "OIHW", "NCHW"),
                feature_group_count=G)
            outs.append(o)
        return jnp.concatenate(outs, axis=1)


if __name__ == "__main__":
    # Small config consistent with the module: two pyramid levels (3x3, 5x5).
    B, C, H, W = 2, 8, 16, 16
    out_channels = [8, 8]
    pyconv_kernels = [3, 5]
    pyconv_groups = [1, 2]

    key = jax.random.PRNGKey(0)
    kx, kw = jax.random.split(key)
    x = jax.random.normal(kx, (B, C, H, W), jnp.float32)

    m = PyConv2dPallas(C, out_channels, pyconv_kernels, pyconv_groups, key=kw)

    y = jax.block_until_ready(m(x))
    assert y.shape == (B, sum(out_channels), H, W), y.shape

    y_ref = jax.block_until_ready(m.reference(x))
    np.testing.assert_allclose(np.asarray(y), np.asarray(y_ref),
                               rtol=1e-4, atol=1e-4)

    print("KERNEL_OK")
</pallas_src>

<mosaic_0001>
module attributes {stable_mosaic.version = 11 : i64} {
  func.func @_pyconv_level_kernel(%arg0: i32, %arg1: memref<1x20x20x8xf32, #tpu.memory_space<vmem>>, %arg2: memref<72x128xf32, #tpu.memory_space<vmem>>, %arg3: memref<1x256x128xf32, #tpu.memory_space<vmem>>, %arg4: memref<256x72xf32, #tpu.memory_space<vmem>>) attributes {dimension_semantics = [#tpu.dimension_semantics<parallel>], iteration_bounds = array<i64: 2>, scalar_prefetch = 0 : i64, scratch_operands = 1 : i64, tpu.core_type = #tpu.core_type<tc>, window_params = [{transform_indices = @transform_0, window_bounds = array<i64: 1, 20, 20, 8>}, {pipeline_mode = #tpu.pipeline_mode<synchronous>, transform_indices = @transform_1, window_bounds = array<i64: 72, 128>}, {transform_indices = @transform_2, window_bounds = array<i64: 1, 256, 128>}]} {
    %c0 = arith.constant 0 : index
    %c1 = arith.constant 1 : index
    %c1_0 = arith.constant 1 : index
    %c0_1 = arith.constant 0 : index
    %0 = vector.load %arg1[%c0, %c1, %c1_0, %c0_1] : memref<1x20x20x8xf32, #tpu.memory_space<vmem>>, vector<1x16x16x8xf32>
    %1 = vector.shape_cast %0 : vector<1x16x16x8xf32> to vector<16x16x8xf32>
    %2 = vector.shape_cast %1 : vector<16x16x8xf32> to vector<256x8xf32>
    %c0_2 = arith.constant 0 : index
    %c0_3 = arith.constant 0 : index
    %3 = vector.load %arg4[%c0_2, %c0_3] : memref<256x72xf32, #tpu.memory_space<vmem>>, vector<256x8xf32>
    tpu.vector_store %arg4[%c0_2, %c0_3], %2 {strides = array<i32>} : memref<256x72xf32, #tpu.memory_space<vmem>>, vector<256x8xf32>,
    %c0_4 = arith.constant 0 : index
    %c1_5 = arith.constant 1 : index
    %c2 = arith.constant 2 : index
    %c0_6 = arith.constant 0 : index
    %4 = vector.load %arg1[%c0_4, %c1_5, %c2, %c0_6] : memref<1x20x20x8xf32, #tpu.memory_space<vmem>>, vector<1x16x16x8xf32>
    %5 = vector.shape_cast %4 : vector<1x16x16x8xf32> to vector<16x16x8xf32>
    %6 = vector.shape_cast %5 : vector<16x16x8xf32> to vector<256x8xf32>
    %c0_7 = arith.constant 0 : index
    %c8 = arith.constant 8 : index
    %7 = vector.load %arg4[%c0_7, %c8] : memref<256x72xf32, #tpu.memory_space<vmem>>, vector<256x8xf32>
    tpu.vector_store %arg4[%c0_7, %c8], %6 {strides = array<i32>} : memref<256x72xf32, #tpu.memory_space<vmem>>, vector<256x8xf32>,
    %c0_8 = arith.constant 0 : index
    %c1_9 = arith.constant 1 : index
    %c3 = arith.constant 3 : index
    %c0_10 = arith.constant 0 : index
    %8 = vector.load %arg1[%c0_8, %c1_9, %c3, %c0_10] : memref<1x20x20x8xf32, #tpu.memory_space<vmem>>, vector<1x16x16x8xf32>
    %9 = vector.shape_cast %8 : vector<1x16x16x8xf32> to vector<16x16x8xf32>
    %10 = vector.shape_cast %9 : vector<16x16x8xf32> to vector<256x8xf32>
    %c0_11 = arith.constant 0 : index
    %c16 = arith.constant 16 : index
    %11 = vector.load %arg4[%c0_11, %c16] : memref<256x72xf32, #tpu.memory_space<vmem>>, vector<256x8xf32>
    tpu.vector_store %arg4[%c0_11, %c16], %10 {strides = array<i32>} : memref<256x72xf32, #tpu.memory_space<vmem>>, vector<256x8xf32>,
    %c0_12 = arith.constant 0 : index
    %c2_13 = arith.constant 2 : index
    %c1_14 = arith.constant 1 : index
    %c0_15 = arith.constant 0 : index
    %12 = vector.load %arg1[%c0_12, %c2_13, %c1_14, %c0_15] : memref<1x20x20x8xf32, #tpu.memory_space<vmem>>, vector<1x16x16x8xf32>
    %13 = vector.shape_cast %12 : vector<1x16x16x8xf32> to vector<16x16x8xf32>
    %14 = vector.shape_cast %13 : vector<16x16x8xf32> to vector<256x8xf32>
    %c0_16 = arith.constant 0 : index
    %c24 = arith.constant 24 : index
    %15 = vector.load %arg4[%c0_16, %c24] : memref<256x72xf32, #tpu.memory_space<vmem>>, vector<256x8xf32>
    tpu.vector_store %arg4[%c0_16, %c24], %14 {strides = array<i32>} : memref<256x72xf32, #tpu.memory_space<vmem>>, vector<256x8xf32>,
    %c0_17 = arith.constant 0 : index
    %c2_18 = arith.constant 2 : index
    %c2_19 = arith.constant 2 : index
    %c0_20 = arith.constant 0 : index
    %16 = vector.load %arg1[%c0_17, %c2_18, %c2_19, %c0_20] : memref<1x20x20x8xf32, #tpu.memory_space<vmem>>, vector<1x16x16x8xf32>
    %17 = vector.shape_cast %16 : vector<1x16x16x8xf32> to vector<16x16x8xf32>
    %18 = vector.shape_cast %17 : vector<16x16x8xf32> to vector<256x8xf32>
    %c0_21 = arith.constant 0 : index
    %c32 = arith.constant 32 : index
    %19 = vector.load %arg4[%c0_21, %c32] : memref<256x72xf32, #tpu.memory_space<vmem>>, vector<256x8xf32>
    tpu.vector_store %arg4[%c0_21, %c32], %18 {strides = array<i32>} : memref<256x72xf32, #tpu.memory_space<vmem>>, vector<256x8xf32>,
    %c0_22 = arith.constant 0 : index
    %c2_23 = arith.constant 2 : index
    %c3_24 = arith.constant 3 : index
    %c0_25 = arith.constant 0 : index
    %20 = vector.load %arg1[%c0_22, %c2_23, %c3_24, %c0_25] : memref<1x20x20x8xf32, #tpu.memory_space<vmem>>, vector<1x16x16x8xf32>
    %21 = vector.shape_cast %20 : vector<1x16x16x8xf32> to vector<16x16x8xf32>
    %22 = vector.shape_cast %21 : vector<16x16x8xf32> to vector<256x8xf32>
    %c0_26 = arith.constant 0 : index
    %c40 = arith.constant 40 : index
    %23 = vector.load %arg4[%c0_26, %c40] : memref<256x72xf32, #tpu.memory_space<vmem>>, vector<256x8xf32>
    tpu.vector_store %arg4[%c0_26, %c40], %22 {strides = array<i32>} : memref<256x72xf32, #tpu.memory_space<vmem>>, vector<256x8xf32>,
    %c0_27 = arith.constant 0 : index
    %c3_28 = arith.constant 3 : index
    %c1_29 = arith.constant 1 : index
    %c0_30 = arith.constant 0 : index
    %24 = vector.load %arg1[%c0_27, %c3_28, %c1_29, %c0_30] : memref<1x20x20x8xf32, #tpu.memory_space<vmem>>, vector<1x16x16x8xf32>
    %25 = vector.shape_cast %24 : vector<1x16x16x8xf32> to vector<16x16x8xf32>
    %26 = vector.shape_cast %25 : vector<16x16x8xf32> to vector<256x8xf32>
    %c0_31 = arith.constant 0 : index
    %c48 = arith.constant 48 : index
    %27 = vector.load %arg4[%c0_31, %c48] : memref<256x72xf32, #tpu.memory_space<vmem>>, vector<256x8xf32>
    tpu.vector_store %arg4[%c0_31, %c48], %26 {strides = array<i32>} : memref<256x72xf32, #tpu.memory_space<vmem>>, vector<256x8xf32>,
    %c0_32 = arith.constant 0 : index
    %c3_33 = arith.constant 3 : index
    %c2_34 = arith.constant 2 : index
    %c0_35 = arith.constant 0 : index
    %28 = vector.load %arg1[%c0_32, %c3_33, %c2_34, %c0_35] : memref<1x20x20x8xf32, #tpu.memory_space<vmem>>, vector<1x16x16x8xf32>
    %29 = vector.shape_cast %28 : vector<1x16x16x8xf32> to vector<16x16x8xf32>
    %30 = vector.shape_cast %29 : vector<16x16x8xf32> to vector<256x8xf32>
    %c0_36 = arith.constant 0 : index
    %c56 = arith.constant 56 : index
    %31 = vector.load %arg4[%c0_36, %c56] : memref<256x72xf32, #tpu.memory_space<vmem>>, vector<256x8xf32>
    tpu.vector_store %arg4[%c0_36, %c56], %30 {strides = array<i32>} : memref<256x72xf32, #tpu.memory_space<vmem>>, vector<256x8xf32>,
    %c0_37 = arith.constant 0 : index
    %c3_38 = arith.constant 3 : index
    %c3_39 = arith.constant 3 : index
    %c0_40 = arith.constant 0 : index
    %32 = vector.load %arg1[%c0_37, %c3_38, %c3_39, %c0_40] : memref<1x20x20x8xf32, #tpu.memory_space<vmem>>, vector<1x16x16x8xf32>
    %33 = vector.shape_cast %32 : vector<1x16x16x8xf32> to vector<16x16x8xf32>
    %34 = vector.shape_cast %33 : vector<16x16x8xf32> to vector<256x8xf32>
    %c0_41 = arith.constant 0 : index
    %c64 = arith.constant 64 : index
    %35 = vector.load %arg4[%c0_41, %c64] : memref<256x72xf32, #tpu.memory_space<vmem>>, vector<256x8xf32>
    tpu.vector_store %arg4[%c0_41, %c64], %34 {strides = array<i32>} : memref<256x72xf32, #tpu.memory_space<vmem>>, vector<256x8xf32>,
    %c0_42 = arith.constant 0 : index
    %c0_43 = arith.constant 0 : index
    %36 = vector.load %arg4[%c0_42, %c0_43] : memref<256x72xf32, #tpu.memory_space<vmem>>, vector<256x72xf32>
    %c0_44 = arith.constant 0 : index
    %c0_45 = arith.constant 0 : index
    %37 = vector.load %arg2[%c0_44, %c0_45] : memref<72x128xf32, #tpu.memory_space<vmem>>, vector<72x128xf32>
    %cst = arith.constant dense<0.000000e+00> : vector<256x128xf32>
    %38 = tpu.matmul %36, %37, %cst {dimension_numbers = #tpu.dot_dimension_numbers<[1], [0], [0], [1], [0, 0, 1, 1], [], []>} : vector<256x72xf32>, vector<72x128xf32>, vector<256x128xf32> -> vector<256x128xf32>
    %c0_46 = arith.constant 0 : index
    %c0_47 = arith.constant 0 : index
    %c0_48 = arith.constant 0 : index
    %39 = vector.load %arg3[%c0_46, %c0_47, %c0_48] : memref<1x256x128xf32, #tpu.memory_space<vmem>>, vector<1x256x128xf32>
    %40 = vector.shape_cast %39 : vector<1x256x128xf32> to vector<256x128xf32>
    %41 = vector.shape_cast %38 : vector<256x128xf32> to vector<1x256x128xf32>
    tpu.vector_store %arg3[%c0_46, %c0_47, %c0_48], %41 {strides = array<i32>} : memref<1x256x128xf32, #tpu.memory_space<vmem>>, vector<1x256x128xf32>,
    return
  }
  func.func @transform_0(%arg0: i32) -> (i32, i32, i32, i32) {
    %c0_i32 = arith.constant 0 : i32
    %c0_i32_0 = arith.constant 0 : i32
    %c0_i32_1 = arith.constant 0 : i32
    %c0_i32_2 = arith.constant 0 : i32
    return %arg0, %c0_i32, %c0_i32_0, %c0_i32_1 : i32, i32, i32, i32
  }
  func.func @transform_1(%arg0: i32) -> (i32, i32) {
    %c0_i32 = arith.constant 0 : i32
    %c0_i32_0 = arith.constant 0 : i32
    %c0_i32_1 = arith.constant 0 : i32
    return %c0_i32, %c0_i32_0 : i32, i32
  }
  func.func @transform_2(%arg0: i32) -> (i32, i32, i32) {
    %c0_i32 = arith.constant 0 : i32
    %c0_i32_0 = arith.constant 0 : i32
    %c0_i32_1 = arith.constant 0 : i32
    return %arg0, %c0_i32, %c0_i32_0 : i32, i32, i32
  }
}

</mosaic_0001>

<bundles_post_ra>
// kernel: tpu_custom_call.1
= control target key start
LH: loop header
LB: loop body
LE: loop exit
PB: predicated region body
PF: predicated region fallthrough
CT: control target
= control target key end

     0   :  { %7 = vsyncpa [#allocation4], 0  ;;  %s4007_s0 = inlined_call_operand.vmem [shape: f32[2,20,20,8], index: 0, kind: input, shape index: {}]   ;;  %s4008_s1 = inlined_call_operand.vmem [shape: f32[72,128], index: 1, kind: input, shape index: {}]   ;;  %s4009_s2 = inlined_call_operand.hbm [shape: f32[2,256,128], index: 2, kind: output, shape index: {}]  }
   0x1   :  { %9 = vsyncpa [#allocation4 + $0x1], 0  ;;  %s2818_s9 = smov 0   ;;  %s2820_s10 = smov 0  }
   0x2   :  { %s2822_s11 = smov 0   ;;  %s2824_s12 = smov 0  }
   0x3 LB: > { %s2839_s13 = sadd.s32 4294967295, %s2791_s12   ;;  %s2225_s14 = sadd.s32 4294967294, %s2791_s12   ;;  %s2791_s12 = sphi %s2824_s12, %s4047_s12   ;;  %s2787_s11 = sphi %s2822_s11, %s4046_s11   ;;  %s2783_s10 = sphi %s2820_s10, %s4045_s10   ;;  %s2779_s9 = sphi %s2818_s9, %s4044_s9  }
   0x4   : > { %s2843_s15 = sadd.s32 1, %s2791_s12   ;;  %s69_s16 = sadd.s32 1, %s2787_s11 }
   0x5   : > { %s66_s17 = ssub.s32 %s2791_s12, %s2843_s15  ;;  %p79_p0 = scmp.ne.s32.totalorder %s2787_s11, %s2783_s10 }
   0x6   : > { %p67_p1 = scmp.eq.s32.totalorder %s66_s17, 0  ;;  %p80_p2 = scmp.eq.s32.totalorder %s2839_s13, 1 }
   0x7   : > { %p85_p3 = scmp.ne.s32.totalorder %s2783_s10, %s2779_s9  ;;  %p86_p4 = scmp.eq.s32.totalorder %s2225_s14, 1 }
   0x8   : > { %s2854_s18 = scalar_select %p67_p1, %s2787_s11, %s69_s16  }
   0x9   : > { %p2856_p5 = por %p80_p2, %p79_p0  ;;  %p2860_p6 = por %p86_p4, %p85_p3 }
   0xa   : > { %p2228_p7 = scmp.ge.s32.totalorder %s2791_s12, 1  ;;  %p115_p8 = scmp.lt.s32.totalorder %s2791_s12, 3 }
   0xc   : > { %p116_p9 = pnand %p2228_p7, %p115_p8 }
   0xe   : > { %119 = sbr.rel (%p116_p9) target bundleno = 868 (0x364), region = 28 }
  0x13   : > { %p137_p10 = scmp.lt.s32.totalorder %s2839_s13, 1  ;;  %s2793_s26 = smov 8   ;;  %vm175_vm0 = vcmask 64512   ;;  %vm368_vm1 = vcmask 130112   ;;  %vm561_vm2 = vcmask 195712   ;;  %vm755_vm3 = vcmask 261312  }
  0x14   : > { %s2794_s27 = smov 16   ;;  %s2795_s28 = smov 24   ;;  %vm948_vm4 = vcmask 326912   ;;  %vm1141_vm5 = vcmask 392512   ;;  %vm1335_vm6 = vcmask 458112   ;;  %vm1528_vm7 = vcmask 523712  }
  0x15   : > { %s138_s21 = scalar_select %p137_p10, %s2839_s13, 1  ;;  %vm1721_vm8 = vcmask 589312   ;;  %vm1795_vm9 = vcmask 588800  }
  0x16   : > { %s2796_s29 = smov 32   ;;  %s2797_s30 = smov 40  }
  0x17   : > { %s2682_s22 = smul.u32 480, %s138_s21  ;;  %s2798_s3 = smov 48  }
  0x18   : > { %s2799_s8 = smov 56   ;;  %s2800_s5 = smov 64  }
  0x19   : > { %s2871_s25 = scalar_lea.vmem %s4007_s0, %s2682_s22  ;;  %s2801_s24 = smov [#allocation3]  }
  0x1a   : > { %v2874_v0 = vld [vmem:[%s2871_s25 + $0x32] sm:$0xff]  ;;  %v2263_v1 = vld [vmem:[%s2871_s25 + $0x1a] sm:$0xff]  ;;  %v2264_v3 = vld [vmem:[%s2871_s25 + $0x22] sm:$0xff] }
  0x1b   : > { %276 = vrot.lane.b32.xlu1 %v2874_v0, %s2793_s26  ;;  %272 = vrot.lane.b32.xlu0 %v2263_v1, %s2793_s26  ;;  %v2881_v2 = vld [vmem:[%s2871_s25 + $0x3a] sm:$0xff]  ;;  %v2888_v4 = vld [vmem:[%s2871_s25 + $0x52] sm:$0xff] }
  0x1c   : > { %v2891_v5 = vld [vmem:[%s2871_s25 + $0x4a] sm:$0xff]  ;;  %v2901_v7 = vld [vmem:[%s2871_s25 + $0x62] sm:$0xff]  ;;  %v2911_v9 = vld [vmem:[%s2871_s25 + $0x7a] sm:$0xff] }
  0x1d   : > { %v2898_v6 = vld [vmem:[%s2871_s25 + $0x6a] sm:$0xff]  ;;  %v2908_v8 = vld [vmem:[%s2871_s25 + $0x82] sm:$0xff]  ;;  %v2918_v10 = vld [vmem:[%s2871_s25 + $0x9a] sm:$0xff] }
  0x1e   : > { %v2921_v11 = vld [vmem:[%s2871_s25 + $0x92] sm:$0xff]  ;;  %v2935_v15 = vld [vmem:[%s2871_s25 + $0xaa] sm:$0xff]  ;;  %v2232_v17 = vld [vmem:[%s2871_s25 + $0x21] sm:$0xff] }
  0x1f   : > { %278 = vrot.lane.b32.xlu1 %v2881_v2, %s2793_s26  ;;  %274 = vrot.lane.b32.xlu0 %v2264_v3, %s2793_s26  ;;  %v2928_v12 = vld [vmem:[%s2871_s25 + $0x31] sm:$0xff]  ;;  %v2231_v13 = vld [vmem:[%s2871_s25 + $0x19] sm:$0xff]  ;;  %177 = vst.msk [vmem:[#allocation2 + $0x8] sm:$0xff] %vm175_vm0, %v2232_v17 }
  0x20   : > { %v2932_v14 = vld [vmem:[%s2871_s25 + $0xb2] sm:$0xff]  ;;  %178 = vst.msk [vmem:[#allocation2 + $0x10] sm:$0xff] %vm175_vm0, %v2928_v12  ;;  %176 = vst.msk [vmem:[#allocation2] sm:$0xff] %vm175_vm0, %v2231_v13  ;;  %v2278_v18 = vld [vmem:[%s2871_s25 + $0xca] sm:$0xff] }
  0x21   : > { %v2941_v16 = vld [vmem:[%s2871_s25 + $0x39] sm:$0xff]  ;;  %v2949_v19 = vld [vmem:[%s2871_s25 + $0x51] sm:$0xff]  ;;  %v2952_v20 = vld [vmem:[%s2871_s25 + $0x49] sm:$0xff] }
  0x22   : > { %179 = vst.msk [vmem:[#allocation2 + $0x18] sm:$0xff] %vm175_vm0, %v2941_v16  ;;  %v2959_v21 = vld [vmem:[%s2871_s25 + $0xc2] sm:$0xff]  ;;  %181 = vst.msk [vmem:[#allocation2 + $0x28] sm:$0xff] %vm175_vm0, %v2949_v19  ;;  %v2977_v25 = vld [vmem:[%s2871_s25 + $0x79] sm:$0xff] }
  0x23   : > { %282 = vrot.lane.b32.xlu1 %v2888_v4, %s2793_s26  ;;  %280 = vrot.lane.b32.xlu0 %v2891_v5, %s2793_s26  ;;  %180 = vst.msk [vmem:[#allocation2 + $0x20] sm:$0xff] %vm175_vm0, %v2952_v20  ;;  %v2966_v22 = vld [vmem:[%s2871_s25 + $0x69] sm:$0xff]  ;;  %v2971_v23 = vld [vmem:[%s2871_s25 + $0x61] sm:$0xff]  ;;  %184 = vst.msk [vmem:[#allocation2 + $0x40] sm:$0xff] %vm175_vm0, %v2977_v25 }
  0x24   : > { %183 = vst.msk [vmem:[#allocation2 + $0x38] sm:$0xff] %vm175_vm0, %v2966_v22  ;;  %v2974_v24 = vld [vmem:[%s2871_s25 + $0x81] sm:$0xff]  ;;  %182 = vst.msk [vmem:[#allocation2 + $0x30] sm:$0xff] %vm175_vm0, %v2971_v23  ;;  %v2986_v26 = vld [vmem:[%s2871_s25 + $0x99] sm:$0xff] }
  0x25   : > { %185 = vst.msk [vmem:[#allocation2 + $0x48] sm:$0xff] %vm175_vm0, %v2974_v24  ;;  %v2989_v27 = vld [vmem:[%s2871_s25 + $0x91] sm:$0xff]  ;;  %v2280_v29 = vld [vmem:[%s2871_s25 + $0xe2] sm:$0xff]  ;;  %v2279_v30 = vld [vmem:[%s2871_s25 + $0xda] sm:$0xff] }
  0x26   : > { %v2992_v28 = vld [vmem:[%s2871_s25 + $0xb1] sm:$0xff]  ;;  %187 = vst.msk [vmem:[#allocation2 + $0x58] sm:$0xff] %vm175_vm0, %v2986_v26  ;;  %186 = vst.msk [vmem:[#allocation2 + $0x50] sm:$0xff] %vm175_vm0, %v2989_v27  ;;  %v3003_v31 = vld [vmem:[%s2871_s25 + $0xa9] sm:$0xff] }
  0x27   : > { %286 = vrot.lane.b32.xlu1 %v2898_v6, %s2793_s26  ;;  %284 = vrot.lane.b32.xlu0 %v2901_v7, %s2793_s26  ;;  %189 = vst.msk [vmem:[#allocation2 + $0x68] sm:$0xff] %vm175_vm0, %v2992_v28  ;;  %v3006_v32 = vld [vmem:[%s2871_s25 + $0xc9] sm:$0xff]  ;;  %v3009_v33 = vld [vmem:[%s2871_s25 + $0xc1] sm:$0xff]  ;;  %188 = vst.msk [vmem:[#allocation2 + $0x60] sm:$0xff] %vm175_vm0, %v3003_v31 }
  0x28   : > { %191 = vst.msk [vmem:[#allocation2 + $0x78] sm:$0xff] %vm175_vm0, %v3006_v32  ;;  %190 = vst.msk [vmem:[#allocation2 + $0x70] sm:$0xff] %vm175_vm0, %v3009_v33  ;;  %v3021_v34 = vld [vmem:[%s2871_s25 + $0xe1] sm:$0xff]  ;;  %v3024_v35 = vld [vmem:[%s2871_s25 + $0xd9] sm:$0xff] }
  0x29   : > { %193 = vst.msk [vmem:[#allocation2 + $0x88] sm:$0xff] %vm175_vm0, %v3021_v34  ;;  %192 = vst.msk [vmem:[#allocation2 + $0x80] sm:$0xff] %vm175_vm0, %v3024_v35  ;;  %v3031_v36 = vld [vmem:[%s2871_s25 + $0xf9] sm:$0xff]  ;;  %v3034_v37 = vld [vmem:[%s2871_s25 + $0xf1] sm:$0xff] }
  0x2a   : > { %v3037_v38 = vld [vmem:[%s2871_s25 + $0x111] sm:$0xff]  ;;  %195 = vst.msk [vmem:[#allocation2 + $0x98] sm:$0xff] %vm175_vm0, %v3031_v36  ;;  %194 = vst.msk [vmem:[#allocation2 + $0x90] sm:$0xff] %vm175_vm0, %v3034_v37  ;;  %v3046_v39 = vld [vmem:[%s2871_s25 + $0x109] sm:$0xff] }
  0x2b   : > { %290 = vrot.lane.b32.xlu1 %v2908_v8, %s2793_s26  ;;  %288 = vrot.lane.b32.xlu0 %v2911_v9, %s2793_s26  ;;  %197 = vst.msk [vmem:[#allocation2 + $0xa8] sm:$0xff] %vm175_vm0, %v3037_v38  ;;  %v3049_v40 = vld [vmem:[%s2871_s25 + $0x129] sm:$0xff]  ;;  %v3052_v41 = vld [vmem:[%s2871_s25 + $0x121] sm:$0xff]  ;;  %196 = vst.msk [vmem:[#allocation2 + $0xa0] sm:$0xff] %vm175_vm0, %v3046_v39 }
  0x2c   : > { %199 = vst.msk [vmem:[#allocation2 + $0xb8] sm:$0xff] %vm175_vm0, %v3049_v40  ;;  %198 = vst.msk [vmem:[#allocation2 + $0xb0] sm:$0xff] %vm175_vm0, %v3052_v41  ;;  %v3063_v42 = vld [vmem:[%s2871_s25 + $0xfa] sm:$0xff]  ;;  %v3066_v43 = vld [vmem:[%s2871_s25 + $0xf2] sm:$0xff] }
  0x2d   : > { %v3069_v44 = vld [vmem:[%s2871_s25 + $0x141] sm:$0xff]  ;;  %v3072_v45 = vld [vmem:[%s2871_s25 + $0x139] sm:$0xff]  ;;  %v3086_v47 = vld [vmem:[%s2871_s25 + $0x10a] sm:$0xff] }
  0x2e   : > { %201 = vst.msk [vmem:[#allocation2 + $0xc8] sm:$0xff] %vm175_vm0, %v3069_v44  ;;  %200 = vst.msk [vmem:[#allocation2 + $0xc0] sm:$0xff] %vm175_vm0, %v3072_v45  ;;  %v3083_v46 = vld [vmem:[%s2871_s25 + $0x112] sm:$0xff]  ;;  %v3103_v50 = vld [vmem:[%s2871_s25 + $0x12a] sm:$0xff] }
  0x2f   : > { %294 = vrot.lane.b32.xlu1 %v2918_v10, %s2793_s26  ;;  %292 = vrot.lane.b32.xlu0 %v2921_v11, %s2793_s26  ;;  %v3089_v48 = vld [vmem:[%s2871_s25 + $0x159] sm:$0xff]  ;;  %v3092_v49 = vld [vmem:[%s2871_s25 + $0x151] sm:$0xff]  ;;  %4028 = vst [vmem:[#allocation6_spill] sm:$0xff] %v3103_v50 }
  0x30   : > { %203 = vst.msk [vmem:[#allocation2 + $0xd8] sm:$0xff] %vm175_vm0, %v3089_v48  ;;  %202 = vst.msk [vmem:[#allocation2 + $0xd0] sm:$0xff] %vm175_vm0, %v3092_v49  ;;  %v3106_v51 = vld [vmem:[%s2871_s25 + $0x122] sm:$0xff]  ;;  %v3109_v52 = vld [vmem:[%s2871_s25 + $0x171] sm:$0xff] }
  0x31   : > { %4029 = vst [vmem:[#allocation7_spill] sm:$0xff] %v3106_v51  ;;  %v3112_v53 = vld [vmem:[%s2871_s25 + $0x169] sm:$0xff]  ;;  %205 = vst.msk [vmem:[#allocation2 + $0xe8] sm:$0xff] %vm175_vm0, %v3109_v52  ;;  %v2287_v55 = vld [vmem:[%s2871_s25 + $0x13a] sm:$0xff] }
  0x32   : > { %204 = vst.msk [vmem:[#allocation2 + $0xe0] sm:$0xff] %vm175_vm0, %v3112_v53  ;;  %v2288_v54 = vld [vmem:[%s2871_s25 + $0x142] sm:$0xff]  ;;  %v2290_v58 = vld [vmem:[%s2871_s25 + $0x15a] sm:$0xff]  ;;  %v2289_v59 = vld [vmem:[%s2871_s25 + $0x152] sm:$0xff] }
  0x33   : > { %298 = vrot.lane.b32.xlu1 %v2932_v14, %s2793_s26  ;;  %296 = vrot.lane.b32.xlu0 %v2935_v15, %s2793_s26  ;;  %v3125_v56 = vld [vmem:[%s2871_s25 + $0x189] sm:$0xff]  ;;  %v3128_v57 = vld [vmem:[%s2871_s25 + $0x181] sm:$0xff] }
  0x34   : > { %207 = vst.msk [vmem:[#allocation2 + $0xf8] sm:$0xff] %vm175_vm0, %v3125_v56  ;;  %206 = vst.msk [vmem:[#allocation2 + $0xf0] sm:$0xff] %vm175_vm0, %v3128_v57  ;;  %v2292_v60 = vld [vmem:[%s2871_s25 + $0x172] sm:$0xff]  ;;  %v2291_v61 = vld [vmem:[%s2871_s25 + $0x16a] sm:$0xff] }
  0x35   : > { %v2294_v62 = vld [vmem:[%s2871_s25 + $0x18a] sm:$0xff]  ;;  %v2293_v63 = vld [vmem:[%s2871_s25 + $0x182] sm:$0xff]  ;;  %v3156_v17 = vld [vmem:[%s2871_s25 + $0x33] sm:$0xff] }
  0x36   : > { %v2296_v1 = vld [vmem:[%s2871_s25 + $0x23] sm:$0xff]  ;;  %v2295_v3 = vld [vmem:[%s2871_s25 + $0x1b] sm:$0xff] }
  0x37   : > { %302 = vrot.lane.b32.xlu1 %v2278_v18, %s2793_s26  ;;  %300 = vrot.lane.b32.xlu0 %v2959_v21, %s2793_s26  ;;  %v3153_v13 = vld [vmem:[%s2871_s25 + $0x3b] sm:$0xff]  ;;  %v3163_v18 = vld [vmem:[%s2871_s25 + $0x53] sm:$0xff] }
  0x3b   : > { %306 = vrot.lane.b32.xlu1 %v2280_v29, %s2793_s26  ;;  %304 = vrot.lane.b32.xlu0 %v2279_v30, %s2793_s26  ;;  %v3166_v29 = vld [vmem:[%s2871_s25 + $0x4b] sm:$0xff] }
  0x3c   : > { %v3173_v30 = vld [vmem:[%s2871_s25 + $0x6b] sm:$0xff] }
  0x3d   : > { %4030 = vst [vmem:[#allocation8_spill] sm:$0xff] %v3173_v30 }
  0x3f   : > { %310 = vrot.lane.b32.xlu1 %v3063_v42, %s2793_s26  ;;  %308 = vrot.lane.b32.xlu0 %v3066_v43, %s2793_s26 }
  0x43   : > { %314 = vrot.lane.b32.xlu1 %v3083_v46, %s2793_s26  ;;  %312 = vrot.lane.b32.xlu0 %v3086_v47, %s2793_s26 }
  0x47   : > { %318 = vrot.lane.b32.xlu1 %v3103_v50, %s2793_s26  ;;  %316 = vrot.lane.b32.xlu0 %v3106_v51, %s2793_s26 }
  0x4b   : > { %322 = vrot.lane.b32.xlu1 %v2288_v54, %s2793_s26  ;;  %320 = vrot.lane.b32.xlu0 %v2287_v55, %s2793_s26  ;;  %v3176_v54 = vld [vmem:[%s2871_s25 + $0x63] sm:$0xff] }
  0x4c   : > { %4031 = vst [vmem:[#allocation9_spill] sm:$0xff] %v3176_v54  ;;  %v2304_v55 = vld [vmem:[%s2871_s25 + $0x83] sm:$0xff] }
  0x4f   : > { %326 = vrot.lane.b32.xlu1 %v2290_v58, %s2793_s26  ;;  %324 = vrot.lane.b32.xlu0 %v2289_v59, %s2793_s26  ;;  %v2303_v58 = vld [vmem:[%s2871_s25 + $0x7b] sm:$0xff] }
  0x50   : > { %v2306_v59 = vld [vmem:[%s2871_s25 + $0x9b] sm:$0xff] }
  0x53   : > { %330 = vrot.lane.b32.xlu1 %v2292_v60, %s2793_s26  ;;  %328 = vrot.lane.b32.xlu0 %v2291_v61, %s2793_s26  ;;  %v2305_v60 = vld [vmem:[%s2871_s25 + $0x93] sm:$0xff] }
  0x54   : > { %v2308_v61 = vld [vmem:[%s2871_s25 + $0xb3] sm:$0xff] }
  0x57   : > { %334 = vrot.lane.b32.xlu1 %v2294_v62, %s2793_s26  ;;  %332 = vrot.lane.b32.xlu0 %v2293_v63, %s2793_s26  ;;  %v2307_v62 = vld [vmem:[%s2871_s25 + $0xab] sm:$0xff] }
  0x58   : > { %v2310_v63 = vld [vmem:[%s2871_s25 + $0xcb] sm:$0xff] }
  0x5b   : > { %467 = vrot.lane.b32.xlu1 %v2296_v1, %s2794_s27  ;;  %465 = vrot.lane.b32.xlu0 %v2295_v3, %s2794_s27  ;;  %v2309_v1 = vld [vmem:[%s2871_s25 + $0xc3] sm:$0xff] }
  0x5c   : > { %v2312_v3 = vld [vmem:[%s2871_s25 + $0xe3] sm:$0xff] }
  0x5f   : > { %471 = vrot.lane.b32.xlu1 %v3153_v13, %s2794_s27  ;;  %469 = vrot.lane.b32.xlu0 %v3156_v17, %s2794_s27 }
  0x63   : > { %475 = vrot.lane.b32.xlu1 %v3163_v18, %s2794_s27  ;;  %473 = vrot.lane.b32.xlu0 %v3166_v29, %s2794_s27 }
  0x67   : > { %479 = vrot.lane.b32.xlu1 %v3173_v30, %s2794_s27  ;;  %477 = vrot.lane.b32.xlu0 %v3176_v54, %s2794_s27  ;;  %v2321_v30 = vld [vmem:[%s2871_s25 + $0x153] sm:$0xff] }
  0x6b   : > { %483 = vrot.lane.b32.xlu1 %v2304_v55, %s2794_s27  ;;  %481 = vrot.lane.b32.xlu0 %v2303_v58, %s2794_s27  ;;  %v2311_v55 = vld [vmem:[%s2871_s25 + $0xdb] sm:$0xff] }
  0x6c   : > { %v3203_v58 = vld [vmem:[%s2871_s25 + $0xfb] sm:$0xff] }
  0x6f   : > { %487 = vrot.lane.b32.xlu1 %v2306_v59, %s2794_s27  ;;  %485 = vrot.lane.b32.xlu0 %v2305_v60, %s2794_s27  ;;  %v3206_v59 = vld [vmem:[%s2871_s25 + $0xf3] sm:$0xff] }
  0x70   : > { %v3213_v60 = vld [vmem:[%s2871_s25 + $0x113] sm:$0xff] }
  0x71   : > { %4032 = vst [vmem:[#allocation10_spill] sm:$0xff] %v3213_v60 }
  0x73   : > { %491 = vrot.lane.b32.xlu1 %v2308_v61, %s2794_s27  ;;  %489 = vrot.lane.b32.xlu0 %v2307_v62, %s2794_s27  ;;  %v3216_v61 = vld [vmem:[%s2871_s25 + $0x10b] sm:$0xff] }
  0x74   : > { %v3223_v62 = vld [vmem:[%s2871_s25 + $0x12b] sm:$0xff] }
  0x75   : > { %4033 = vst [vmem:[#allocation11_spill] sm:$0xff] %v3223_v62 }
  0x77   : > { %495 = vrot.lane.b32.xlu1 %v2310_v63, %s2794_s27  ;;  %493 = vrot.lane.b32.xlu0 %v2309_v1, %s2794_s27  ;;  %v3226_v63 = vld [vmem:[%s2871_s25 + $0x123] sm:$0xff] }
  0x78   : > { %4034 = vst [vmem:[#allocation12_spill] sm:$0xff] %v3226_v63  ;;  %v2320_v1 = vld [vmem:[%s2871_s25 + $0x143] sm:$0xff] }
  0x7b   : > { %499 = vrot.lane.b32.xlu1 %v2312_v3, %s2794_s27  ;;  %497 = vrot.lane.b32.xlu0 %v2311_v55, %s2794_s27  ;;  %v3234_v3 = vld [vmem:[%s2871_s25 + $0x13b] sm:$0xff] }
  0x7c   : > { %4035 = vst [vmem:[#allocation13_spill] sm:$0xff] %v3234_v3  ;;  %v2322_v55 = vld [vmem:[%s2871_s25 + $0x15b] sm:$0xff] }
  0x7f   : > { %503 = vrot.lane.b32.xlu1 %v3203_v58, %s2794_s27  ;;  %501 = vrot.lane.b32.xlu0 %v3206_v59, %s2794_s27 }
  0x83   : > { %507 = vrot.lane.b32.xlu1 %v3213_v60, %s2794_s27  ;;  %505 = vrot.lane.b32.xlu0 %v3216_v61, %s2794_s27 }
  0x87   : > { %511 = vrot.lane.b32.xlu1 %v3223_v62, %s2794_s27  ;;  %509 = vrot.lane.b32.xlu0 %v3226_v63, %s2794_s27  ;;  %v2324_v62 = vld [vmem:[%s2871_s25 + $0x173] sm:$0xff] }
  0x8b   : > { %515 = vrot.lane.b32.xlu1 %v2320_v1, %s2794_s27  ;;  %513 = vrot.lane.b32.xlu0 %v3234_v3, %s2794_s27  ;;  %v2323_v1 = vld [vmem:[%s2871_s25 + $0x16b] sm:$0xff] }
  0x8c   : > { %v2326_v3 = vld [vmem:[%s2871_s25 + $0x18b] sm:$0xff] }
  0x8d   : > { %v277_v54 = vpop.permute.xlu1 %276  ;;  %v273_v50 = vpop.permute.xlu0 %272 }
  0x8e   : > { %371 = vst.msk [vmem:[#allocation2 + $0x10] sm:$0xff] %vm368_vm1, %v277_v54  ;;  %369 = vst.msk [vmem:[#allocation2] sm:$0xff] %vm368_vm1, %v273_v50  ;;  %v2325_v54 = vld [vmem:[%s2871_s25 + $0x183] sm:$0xff] }
  0x8f   : > { %519 = vrot.lane.b32.xlu1 %v2322_v55, %s2794_s27  ;;  %517 = vrot.lane.b32.xlu0 %v2321_v30, %s2794_s27 }
  0x91   : > { %v279_v63 = vpop.permute.xlu1 %278  ;;  %v275_v51 = vpop.permute.xlu0 %274 }
  0x92   : > { %372 = vst.msk [vmem:[#allocation2 + $0x18] sm:$0xff] %vm368_vm1, %v279_v63  ;;  %370 = vst.msk [vmem:[#allocation2 + $0x8] sm:$0xff] %vm368_vm1, %v275_v51 }
  0x93   : > { %523 = vrot.lane.b32.xlu1 %v2324_v62, %s2794_s27  ;;  %521 = vrot.lane.b32.xlu0 %v2323_v1, %s2794_s27 }
  0x95   : > { %v283_v60 = vpop.permute.xlu1 %282  ;;  %v281_v50 = vpop.permute.xlu0 %280 }
  0x96   : > { %374 = vst.msk [vmem:[#allocation2 + $0x28] sm:$0xff] %vm368_vm1, %v283_v60  ;;  %373 = vst.msk [vmem:[#allocation2 + $0x20] sm:$0xff] %vm368_vm1, %v281_v50 }
  0x97   : > { %527 = vrot.lane.b32.xlu1 %v2326_v3, %s2794_s27  ;;  %525 = vrot.lane.b32.xlu0 %v2325_v54, %s2794_s27  ;;  %s2735_s27 = sshll.u32 %s2801_s24, 4  ;;  %s2736_s27 = int_to_ptr.vmem [resolvable:$false] %s2735_s27 }
  0x99   : > { %v287_v30 = vpop.permute.xlu1 %286  ;;  %v285_v63 = vpop.permute.xlu0 %284 }
  0x9a   : > { %376 = vst.msk [vmem:[#allocation2 + $0x38] sm:$0xff] %vm368_vm1, %v287_v30  ;;  %375 = vst.msk [vmem:[#allocation2 + $0x30] sm:$0xff] %vm368_vm1, %v285_v63 }
  0x9b   : > { %661 = vrot.lane.b32.xlu1 %v2941_v16, %s2795_s28  ;;  %659 = vrot.lane.b32.xlu0 %v2928_v12, %s2795_s28 }
  0x9d   : > { %v291_v51 = vpop.permute.xlu1 %290  ;;  %v289_v60 = vpop.permute.xlu0 %288 }
  0x9e   : > { %378 = vst.msk [vmem:[#allocation2 + $0x48] sm:$0xff] %vm368_vm1, %v291_v51  ;;  %377 = vst.msk [vmem:[#allocation2 + $0x40] sm:$0xff] %vm368_vm1, %v289_v60 }
  0x9f   : > { %665 = vrot.lane.b32.xlu1 %v2949_v19, %s2795_s28  ;;  %663 = vrot.lane.b32.xlu0 %v2952_v20, %s2795_s28 }
  0xa1   : > { %v295_v62 = vpop.permute.xlu1 %294  ;;  %v293_v3 = vpop.permute.xlu0 %292 }
  0xa2   : > { %380 = vst.msk [vmem:[#allocation2 + $0x58] sm:$0xff] %vm368_vm1, %v295_v62  ;;  %379 = vst.msk [vmem:[#allocation2 + $0x50] sm:$0xff] %vm368_vm1, %v293_v3 }
  0xa3   : > { %669 = vrot.lane.b32.xlu1 %v2966_v22, %s2795_s28  ;;  %667 = vrot.lane.b32.xlu0 %v2971_v23, %s2795_s28 }
  0xa5   : > { %v299_v12 = vpop.permute.xlu1 %298  ;;  %v297_v16 = vpop.permute.xlu0 %296 }
  0xa6   : > { %382 = vst.msk [vmem:[#allocation2 + $0x68] sm:$0xff] %vm368_vm1, %v299_v12  ;;  %381 = vst.msk [vmem:[#allocation2 + $0x60] sm:$0xff] %vm368_vm1, %v297_v16 }
  0xa7   : > { %673 = vrot.lane.b32.xlu1 %v2974_v24, %s2795_s28  ;;  %671 = vrot.lane.b32.xlu0 %v2977_v25, %s2795_s28 }
  0xa9   : > { %v303_v55 = vpop.permute.xlu1 %302  ;;  %v301_v1 = vpop.permute.xlu0 %300 }
  0xaa   : > { %384 = vst.msk [vmem:[#allocation2 + $0x78] sm:$0xff] %vm368_vm1, %v303_v55  ;;  %383 = vst.msk [vmem:[#allocation2 + $0x70] sm:$0xff] %vm368_vm1, %v301_v1 }
  0xab   : > { %677 = vrot.lane.b32.xlu1 %v2986_v26, %s2795_s28  ;;  %675 = vrot.lane.b32.xlu0 %v2989_v27, %s2795_s28 }
  0xad   : > { %v307_v54 = vpop.permute.xlu1 %306  ;;  %v305_v50 = vpop.permute.xlu0 %304 }
  0xae   : > { %386 = vst.msk [vmem:[#allocation2 + $0x88] sm:$0xff] %vm368_vm1, %v307_v54  ;;  %385 = vst.msk [vmem:[#allocation2 + $0x80] sm:$0xff] %vm368_vm1, %v305_v50  ;;  %v2358_v54 = vld [vmem:[%s2871_s25 + $0x1a1] sm:$0xff]  ;;  %v2357_v50 = vld [vmem:[%s2871_s25 + $0x199] sm:$0xff] }
  0xaf   : > { %681 = vrot.lane.b32.xlu1 %v2992_v28, %s2795_s28  ;;  %679 = vrot.lane.b32.xlu0 %v3003_v31, %s2795_s28 }
  0xb1   : > { %v311_v30 = vpop.permute.xlu1 %310  ;;  %v309_v63 = vpop.permute.xlu0 %308 }
  0xb2   : > { %388 = vst.msk [vmem:[#allocation2 + $0x98] sm:$0xff] %vm368_vm1, %v311_v30  ;;  %387 = vst.msk [vmem:[#allocation2 + $0x90] sm:$0xff] %vm368_vm1, %v309_v63 }
  0xb3   : > { %685 = vrot.lane.b32.xlu1 %v3006_v32, %s2795_s28  ;;  %683 = vrot.lane.b32.xlu0 %v3009_v33, %s2795_s28 }
  0xb5   : > { %v315_v51 = vpop.permute.xlu1 %314  ;;  %v313_v60 = vpop.permute.xlu0 %312 }
  0xb6   : > { %390 = vst.msk [vmem:[#allocation2 + $0xa8] sm:$0xff] %vm368_vm1, %v315_v51  ;;  %389 = vst.msk [vmem:[#allocation2 + $0xa0] sm:$0xff] %vm368_vm1, %v313_v60 }
  0xb7   : > { %689 = vrot.lane.b32.xlu1 %v3021_v34, %s2795_s28  ;;  %687 = vrot.lane.b32.xlu0 %v3024_v35, %s2795_s28 }
  0xb9   : > { %v319_v28 = vpop.permute.xlu1 %318  ;;  %v317_v31 = vpop.permute.xlu0 %316 }
  0xba   : > { %392 = vst.msk [vmem:[#allocation2 + $0xb8] sm:$0xff] %vm368_vm1, %v319_v28  ;;  %391 = vst.msk [vmem:[#allocation2 + $0xb0] sm:$0xff] %vm368_vm1, %v317_v31 }
  0xbb   : > { %693 = vrot.lane.b32.xlu1 %v3031_v36, %s2795_s28  ;;  %691 = vrot.lane.b32.xlu0 %v3034_v37, %s2795_s28 }
  0xbd   : > { %v323_v32 = vpop.permute.xlu1 %322  ;;  %v321_v33 = vpop.permute.xlu0 %320 }
  0xbe   : > { %394 = vst.msk [vmem:[#allocation2 + $0xc8] sm:$0xff] %vm368_vm1, %v323_v32  ;;  %393 = vst.msk [vmem:[#allocation2 + $0xc0] sm:$0xff] %vm368_vm1, %v321_v33 }
  0xbf   : > { %697 = vrot.lane.b32.xlu1 %v3037_v38, %s2795_s28  ;;  %695 = vrot.lane.b32.xlu0 %v3046_v39, %s2795_s28 }
  0xc1   : > { %v327_v34 = vpop.permute.xlu1 %326  ;;  %v325_v35 = vpop.permute.xlu0 %324 }
  0xc2   : > { %396 = vst.msk [vmem:[#allocation2 + $0xd8] sm:$0xff] %vm368_vm1, %v327_v34  ;;  %395 = vst.msk [vmem:[#allocation2 + $0xd0] sm:$0xff] %vm368_vm1, %v325_v35 }
  0xc3   : > { %701 = vrot.lane.b32.xlu1 %v3049_v40, %s2795_s28  ;;  %699 = vrot.lane.b32.xlu0 %v3052_v41, %s2795_s28 }
  0xc5   : > { %v331_v36 = vpop.permute.xlu1 %330  ;;  %v329_v37 = vpop.permute.xlu0 %328 }
  0xc6   : > { %398 = vst.msk [vmem:[#allocation2 + $0xe8] sm:$0xff] %vm368_vm1, %v331_v36  ;;  %397 = vst.msk [vmem:[#allocation2 + $0xe0] sm:$0xff] %vm368_vm1, %v329_v37  ;;  %v1791_v36 = vld [vmem:[%s4008_s1 + $0x28] sm:$0xff] }
  0xc7   : > { %705 = vrot.lane.b32.xlu1 %v3069_v44, %s2795_s28  ;;  %703 = vrot.lane.b32.xlu0 %v3072_v45, %s2795_s28 }
  0xc9   : > { %v335_v62 = vpop.permute.xlu1 %334  ;;  %v333_v3 = vpop.permute.xlu0 %332 }
  0xca   : > { %400 = vst.msk [vmem:[#allocation2 + $0xf8] sm:$0xff] %vm368_vm1, %v335_v62  ;;  %399 = vst.msk [vmem:[#allocation2 + $0xf0] sm:$0xff] %vm368_vm1, %v333_v3 }
  0xcb   : > { %709 = vrot.lane.b32.xlu1 %v3089_v48, %s2795_s28  ;;  %707 = vrot.lane.b32.xlu0 %v3092_v49, %s2795_s28 }
  0xcd   : > { %v468_v12 = vpop.permute.xlu1 %467  ;;  %v466_v16 = vpop.permute.xlu0 %465 }
  0xce   : > { %563 = vst.msk [vmem:[#allocation2 + $0x8] sm:$0xff] %vm561_vm2, %v468_v12  ;;  %562 = vst.msk [vmem:[#allocation2] sm:$0xff] %vm561_vm2, %v466_v16  ;;  %v1788_v12 = vld [vmem:[%s4008_s1 + $0x10] sm:$0xff] }
  0xcf   : > { %713 = vrot.lane.b32.xlu1 %v3109_v52, %s2795_s28  ;;  %711 = vrot.lane.b32.xlu0 %v3112_v53, %s2795_s28 }
  0xd1   : > { %v472_v55 = vpop.permute.xlu1 %471  ;;  %v470_v1 = vpop.permute.xlu0 %469 }
  0xd2   : > { %565 = vst.msk [vmem:[#allocation2 + $0x18] sm:$0xff] %vm561_vm2, %v472_v55  ;;  %564 = vst.msk [vmem:[#allocation2 + $0x10] sm:$0xff] %vm561_vm2, %v470_v1  ;;  %v1786_v1 = vld [vmem:[%s4008_s1] sm:$0xff] }
  0xd3   : > { %717 = vrot.lane.b32.xlu1 %v3125_v56, %s2795_s28  ;;  %715 = vrot.lane.b32.xlu0 %v3128_v57, %s2795_s28 }
  0xd5   : > { %v476_v30 = vpop.permute.xlu1 %475  ;;  %v474_v63 = vpop.permute.xlu0 %473 }
  0xd6   : > { %567 = vst.msk [vmem:[#allocation2 + $0x28] sm:$0xff] %vm561_vm2, %v476_v30  ;;  %566 = vst.msk [vmem:[#allocation2 + $0x20] sm:$0xff] %vm561_vm2, %v474_v63  ;;  %v4036_v30 = vld [vmem:[#allocation10_spill] sm:$0xff] }
  0xd7   : > { %721 = vrot.lane.b32.xlu1 %v2358_v54, %s2795_s28  ;;  %719 = vrot.lane.b32.xlu0 %v2357_v50, %s2795_s28  ;;  %s2737_s28 = scalar_lea.vmem %s2736_s27, 8192 }
  0xd9   : > { %v480_v51 = vpop.permute.xlu1 %479  ;;  %v478_v60 = vpop.permute.xlu0 %477 }
  0xda   : > { %569 = vst.msk [vmem:[#allocation2 + $0x38] sm:$0xff] %vm561_vm2, %v480_v51  ;;  %568 = vst.msk [vmem:[#allocation2 + $0x30] sm:$0xff] %vm561_vm2, %v478_v60 }
  0xdb   : > { %854 = vrot.lane.b32.xlu1 %v2881_v2, %s2796_s29  ;;  %852 = vrot.lane.b32.xlu0 %v2874_v0, %s2796_s29 }
  0xdd   : > { %v484_v56 = vpop.permute.xlu1 %483  ;;  %v482_v57 = vpop.permute.xlu0 %481 }
  0xde   : > { %571 = vst.msk [vmem:[#allocation2 + $0x48] sm:$0xff] %vm561_vm2, %v484_v56  ;;  %570 = vst.msk [vmem:[#allocation2 + $0x40] sm:$0xff] %vm561_vm2, %v482_v57 }
  0xdf   : > { %858 = vrot.lane.b32.xlu1 %v2888_v4, %s2796_s29  ;;  %856 = vrot.lane.b32.xlu0 %v2891_v5, %s2796_s29 }
  0xe1   : > { %v488_v28 = vpop.permute.xlu1 %487  ;;  %v486_v31 = vpop.permute.xlu0 %485 }
  0xe2   : > { %573 = vst.msk [vmem:[#allocation2 + $0x58] sm:$0xff] %vm561_vm2, %v488_v28  ;;  %572 = vst.msk [vmem:[#allocation2 + $0x50] sm:$0xff] %vm561_vm2, %v486_v31 }
  0xe3   : > { %862 = vrot.lane.b32.xlu1 %v2898_v6, %s2796_s29  ;;  %860 = vrot.lane.b32.xlu0 %v2901_v7, %s2796_s29 }
  0xe5   : > { %v492_v0 = vpop.permute.xlu1 %491  ;;  %v490_v2 = vpop.permute.xlu0 %489 }
  0xe6   : > { %575 = vst.msk [vmem:[#allocation2 + $0x68] sm:$0xff] %vm561_vm2, %v492_v0  ;;  %574 = vst.msk [vmem:[#allocation2 + $0x60] sm:$0xff] %vm561_vm2, %v490_v2  ;;  %v4039_v2 = vld [vmem:[#allocation12_spill] sm:$0xff] }
  0xe7   : > { %866 = vrot.lane.b32.xlu1 %v2908_v8, %s2796_s29  ;;  %864 = vrot.lane.b32.xlu0 %v2911_v9, %s2796_s29 }
  0xe9   : > { %v496_v32 = vpop.permute.xlu1 %495  ;;  %v494_v33 = vpop.permute.xlu0 %493 }
  0xea   : > { %577 = vst.msk [vmem:[#allocation2 + $0x78] sm:$0xff] %vm561_vm2, %v496_v32  ;;  %576 = vst.msk [vmem:[#allocation2 + $0x70] sm:$0xff] %vm561_vm2, %v494_v33  ;;  %v4040_v32 = vld [vmem:[#allocation9_spill] sm:$0xff] }
  0xeb   : > { %870 = vrot.lane.b32.xlu1 %v2918_v10, %s2796_s29  ;;  %868 = vrot.lane.b32.xlu0 %v2921_v11, %s2796_s29 }
  0xed   : > { %v500_v6 = vpop.permute.xlu1 %499  ;;  %v498_v34 = vpop.permute.xlu0 %497 }
  0xee   : > { %579 = vst.msk [vmem:[#allocation2 + $0x88] sm:$0xff] %vm561_vm2, %v500_v6  ;;  %578 = vst.msk [vmem:[#allocation2 + $0x80] sm:$0xff] %vm561_vm2, %v498_v34 }
  0xef   : > { %874 = vrot.lane.b32.xlu1 %v2932_v14, %s2796_s29  ;;  %872 = vrot.lane.b32.xlu0 %v2935_v15, %s2796_s29 }
  0xf1   : > { %v504_v8 = vpop.permute.xlu1 %503  ;;  %v502_v9 = vpop.permute.xlu0 %501 }
  0xf2   : > { %581 = vst.msk [vmem:[#allocation2 + $0x98] sm:$0xff] %vm561_vm2, %v504_v8  ;;  %580 = vst.msk [vmem:[#allocation2 + $0x90] sm:$0xff] %vm561_vm2, %v502_v9  ;;  %v4041_v9 = vld [vmem:[#allocation8_spill] sm:$0xff] }
  0xf3   : > { %884 = vrot.lane.b32.xlu1 %v3066_v43, %s2796_s29  ;;  %876 = vrot.lane.b32.xlu0 %v2959_v21, %s2796_s29 }
  0xf5   : > { %v508_v10 = vpop.permute.xlu1 %507  ;;  %v506_v11 = vpop.permute.xlu0 %505 }
  0xf6   : > { %583 = vst.msk [vmem:[#allocation2 + $0xa8] sm:$0xff] %vm561_vm2, %v508_v10  ;;  %582 = vst.msk [vmem:[#allocation2 + $0xa0] sm:$0xff] %vm561_vm2, %v506_v11 }
  0xf7   : > { %1045 = vrot.lane.b32.xlu1 %v3156_v17, %s2797_s30  ;;  %886 = vrot.lane.b32.xlu0 %v3063_v42, %s2796_s29 }
  0xf9   : > { %v512_v14 = vpop.permute.xlu1 %511  ;;  %v510_v15 = vpop.permute.xlu0 %509 }
  0xfa   : > { %585 = vst.msk [vmem:[#allocation2 + $0xb8] sm:$0xff] %vm561_vm2, %v512_v14  ;;  %584 = vst.msk [vmem:[#allocation2 + $0xb0] sm:$0xff] %vm561_vm2, %v510_v15  ;;  %v4042_v14 = vld [vmem:[#allocation11_spill] sm:$0xff] }
  0xfb   : > { %1047 = vrot.lane.b32.xlu1 %v3153_v13, %s2797_s30  ;;  %1077 = vrot.lane.b32.xlu0 %v3206_v59, %s2797_s30  ;;  %v1794_v13 = vld [vmem:[%s4008_s1 + $0x40] sm:$0xff]  ;;  %v1793_v59 = vld [vmem:[%s4008_s1 + $0x38] sm:$0xff] }
  0xfc   : > { %2598 = vmatprep.subr.mxu0 %v1794_v13  ;;  %2664 = vmatprep.subr.mxu1 %v1794_v13 }
  0xfd   : > { %v516_v21 = vpop.permute.xlu1 %515  ;;  %v514_v43 = vpop.permute.xlu0 %513  ;;  %2599 = vmatpush3.msra.mxu0 %v1794_v13  ;;  %2673 = vmatpush3.msra.mxu1 %v1794_v13 }
  0xfe   : > { %587 = vst.msk [vmem:[#allocation2 + $0xc8] sm:$0xff] %vm561_vm2, %v516_v21  ;;  %586 = vst.msk [vmem:[#allocation2 + $0xc0] sm:$0xff] %vm561_vm2, %v514_v43  ;;  %2600 = vmatprep.subr.mxu0 %v1793_v59  ;;  %2665 = vmatprep.subr.mxu1 %v1793_v59 }
  0xff   : > { %1239 = vrot.lane.b32.xlu1 %v2952_v20, %s2798_s3  ;;  %1079 = vrot.lane.b32.xlu0 %v3203_v58, %s2797_s30 }
 0x100   : > { %2601 = vmatpush3.msra.mxu0 %v1793_v59  ;;  %2674 = vmatpush3.msra.mxu1 %v1793_v59  ;;  %v2460_v59 = vld [vmem:[%s2871_s25 + $0x82] sm:$0xff] }
 0x101   : > { %v520_v42 = vpop.permute.xlu1 %519  ;;  %v518_v17 = vpop.permute.xlu0 %517 }
 0x102   : > { %589 = vst.msk [vmem:[#allocation2 + $0xd8] sm:$0xff] %vm561_vm2, %v520_v42  ;;  %588 = vst.msk [vmem:[#allocation2 + $0xd0] sm:$0xff] %vm561_vm2, %v518_v17 }
 0x103   : > { %1241 = vrot.lane.b32.xlu1 %v2949_v19, %s2798_s3  ;;  %1271 = vrot.lane.b32.xlu0 %v3046_v39, %s2798_s3  ;;  %v1792_v19 = vld [vmem:[%s4008_s1 + $0x30] sm:$0xff] }
 0x104   : > { %2602 = vmatprep.subr.mxu0 %v1792_v19  ;;  %2666 = vmatprep.subr.mxu1 %v1792_v19 }
 0x105   : > { %v524_v20 = vpop.permute.xlu1 %523  ;;  %v522_v58 = vpop.permute.xlu0 %521  ;;  %2603 = vmatpush3.msra.mxu0 %v1792_v19  ;;  %2675 = vmatpush3.msra.mxu1 %v1792_v19 }
 0x106   : > { %591 = vst.msk [vmem:[#allocation2 + $0xe8] sm:$0xff] %vm561_vm2, %v524_v20  ;;  %590 = vst.msk [vmem:[#allocation2 + $0xe0] sm:$0xff] %vm561_vm2, %v522_v58  ;;  %2604 = vmatprep.subr.mxu0 %v1791_v36  ;;  %2667 = vmatprep.subr.mxu1 %v1791_v36 }
 0x107   : > { %1432 = vrot.lane.b32.xlu1 %v2891_v5, %s2799_s8  ;;  %1273 = vrot.lane.b32.xlu0 %v3037_v38, %s2798_s3  ;;  %v1790_v5 = vld [vmem:[%s4008_s1 + $0x20] sm:$0xff] }
 0x108   : > { %2605 = vmatpush3.msra.mxu0 %v1791_v36  ;;  %2676 = vmatpush3.msra.mxu1 %v1791_v36 }
 0x109   : > { %v528_v39 = vpop.permute.xlu1 %527  ;;  %v526_v35 = vpop.permute.xlu0 %525  ;;  %2606 = vmatprep.subr.mxu0 %v1790_v5  ;;  %2668 = vmatprep.subr.mxu1 %v1790_v5 }
 0x10a   : > { %593 = vst.msk [vmem:[#allocation2 + $0xf8] sm:$0xff] %vm561_vm2, %v528_v39  ;;  %592 = vst.msk [vmem:[#allocation2 + $0xf0] sm:$0xff] %vm561_vm2, %v526_v35  ;;  %2607 = vmatpush3.msra.mxu0 %v1790_v5  ;;  %2677 = vmatpush3.msra.mxu1 %v1790_v5  ;;  %v4043_v5 = vld [vmem:[#allocation13_spill] sm:$0xff] }
 0x10b   : > { %888 = vrot.lane.b32.xlu1 %v3086_v47, %s2796_s29  ;;  %1464 = vrot.lane.b32.xlu0 %v3086_v47, %s2799_s8  ;;  %v1789_v47 = vld [vmem:[%s4008_s1 + $0x18] sm:$0xff] }
 0x10c   : > { %2608 = vmatprep.subr.mxu0 %v1789_v47  ;;  %2669 = vmatprep.subr.mxu1 %v1789_v47 }
 0x10d   : > { %v662_v38 = vpop.permute.xlu1 %661  ;;  %v660_v37 = vpop.permute.xlu0 %659  ;;  %2609 = vmatpush3.msra.mxu0 %v1789_v47  ;;  %2678 = vmatpush3.msra.mxu1 %v1789_v47  ;;  %v2492_v47 = vld [vmem:[%s2871_s25 + $0x83] sm:$0xff] }
 0x10e   : > { %757 = vst.msk [vmem:[#allocation2 + $0x8] sm:$0xff] %vm755_vm3, %v662_v38  ;;  %756 = vst.msk [vmem:[#allocation2] sm:$0xff] %vm755_vm3, %v660_v37  ;;  %2610 = vmatprep.subr.mxu0 %v1788_v12  ;;  %2670 = vmatprep.subr.mxu1 %v1788_v12 }
 0x10f   : > { %1466 = vrot.lane.b32.xlu1 %v3083_v46, %s2799_s8  ;;  %1434 = vrot.lane.b32.xlu0 %v2888_v4, %s2799_s8  ;;  %v1787_v4 = vld [vmem:[%s4008_s1 + $0x8] sm:$0xff] }
 0x110   : > { %2611 = vmatpush3.msra.mxu0 %v1788_v12  ;;  %2679 = vmatpush3.msra.mxu1 %v1788_v12  ;;  %v2508_v12 = vld [vmem:[%s2871_s25 + $0x143] sm:$0xff] }
 0x111   : > { %v666_v62 = vpop.permute.xlu1 %665  ;;  %v664_v3 = vpop.permute.xlu0 %663  ;;  %2612 = vmatprep.subr.mxu0 %v1787_v4  ;;  %2671 = vmatprep.subr.mxu1 %v1787_v4 }
 0x112   : > { %759 = vst.msk [vmem:[#allocation2 + $0x18] sm:$0xff] %vm755_vm3, %v666_v62  ;;  %758 = vst.msk [vmem:[#allocation2 + $0x10] sm:$0xff] %vm755_vm3, %v664_v3  ;;  %2613 = vmatpush3.msra.mxu0 %v1787_v4  ;;  %2680 = vmatpush3.msra.mxu1 %v1787_v4 }
 0x113   : > { %1657 = vrot.lane.b32.xlu1 %v3216_v61, %s2800_s5  ;;  %1625 = vrot.lane.b32.xlu0 %v3166_v29, %s2800_s5 }
 0x114   : > { %2614 = vmatprep.subr.mxu0 %v1786_v1  ;;  %2672 = vmatprep.subr.mxu1 %v1786_v1 }
 0x115   : > { %v670_v16 = vpop.permute.xlu1 %669  ;;  %v668_v55 = vpop.permute.xlu0 %667  ;;  %2615 = vmatpush3.msra.mxu0 %v1786_v1  ;;  %2681 = vmatpush3.msra.mxu1 %v1786_v1 }
 0x116   : > { %761 = vst.msk [vmem:[#allocation2 + $0x28] sm:$0xff] %vm755_vm3, %v670_v16  ;;  %760 = vst.msk [vmem:[#allocation2 + $0x20] sm:$0xff] %vm755_vm3, %v668_v55 }
 0x117   : > { %1049 = vrot.lane.b32.xlu1 %v3166_v29, %s2797_s30  ;;  %890 = vrot.lane.b32.xlu0 %v3083_v46, %s2796_s29 }
 0x119   : > { %v674_v54 = vpop.permute.xlu1 %673  ;;  %v672_v50 = vpop.permute.xlu0 %671 }
 0x11a   : > { %763 = vst.msk [vmem:[#allocation2 + $0x38] sm:$0xff] %vm755_vm3, %v674_v54  ;;  %762 = vst.msk [vmem:[#allocation2 + $0x30] sm:$0xff] %vm755_vm3, %v672_v50 }
 0x11b   : > { %1627 = vrot.lane.b32.xlu1 %v3163_v18, %s2800_s5  ;;  %1081 = vrot.lane.b32.xlu0 %v3216_v61, %s2797_s30 }
 0x11d   : > { %v678_v29 = vpop.permute.xlu1 %677  ;;  %v676_v46 = vpop.permute.xlu0 %675 }
 0x11e   : > { %765 = vst.msk [vmem:[#allocation2 + $0x48] sm:$0xff] %vm755_vm3, %v678_v29  ;;  %764 = vst.msk [vmem:[#allocation2 + $0x40] sm:$0xff] %vm755_vm3, %v676_v46  ;;  %v2461_v29 = vld [vmem:[%s2871_s25 + $0x92] sm:$0xff] }
 0x11f   : > { %1051 = vrot.lane.b32.xlu1 %v3163_v18, %s2797_s30  ;;  %1659 = vrot.lane.b32.xlu0 %v4036_v30, %s2800_s5 }
 0x121   : > { %v682_v63 = vpop.permute.xlu1 %681  ;;  %v680_v51 = vpop.permute.xlu0 %679 }
 0x122   : > { %767 = vst.msk [vmem:[#allocation2 + $0x58] sm:$0xff] %vm755_vm3, %v682_v63  ;;  %766 = vst.msk [vmem:[#allocation2 + $0x50] sm:$0xff] %vm755_vm3, %v680_v51  ;;  %v2478_v63 = vld [vmem:[%s2871_s25 + $0x15a] sm:$0xff] }
 0x123   : > { %1243 = vrot.lane.b32.xlu1 %v2971_v23, %s2798_s3  ;;  %1083 = vrot.lane.b32.xlu0 %v4036_v30, %s2797_s30  ;;  %v2383_v30 = vld [vmem:[%s2871_s25 + $0x152] sm:$0xff]  ;;  %v2462_v51 = vld [vmem:[%s2871_s25 + $0x9a] sm:$0xff] }
 0x125   : > { %v686_v61 = vpop.permute.xlu1 %685  ;;  %v684_v60 = vpop.permute.xlu0 %683 }
 0x126   : > { %769 = vst.msk [vmem:[#allocation2 + $0x68] sm:$0xff] %vm755_vm3, %v686_v61  ;;  %768 = vst.msk [vmem:[#allocation2 + $0x60] sm:$0xff] %vm755_vm3, %v684_v60 }
 0x127   : > { %1245 = vrot.lane.b32.xlu1 %v2966_v22, %s2798_s3  ;;  %1275 = vrot.lane.b32.xlu0 %v3052_v41, %s2798_s3  ;;  %v4037_v22 = vld [vmem:[#allocation7_spill] sm:$0xff] }
 0x128   : > { %v2458_v41 = vld [vmem:[%s2871_s25 + $0x6a] sm:$0xff] }
 0x129   : > { %v690_v18 = vpop.permute.xlu1 %689  ;;  %v688_v56 = vpop.permute.xlu0 %687 }
 0x12a   : > { %771 = vst.msk [vmem:[#allocation2 + $0x78] sm:$0xff] %vm755_vm3, %v690_v18  ;;  %770 = vst.msk [vmem:[#allocation2 + $0x70] sm:$0xff] %vm755_vm3, %v688_v56  ;;  %v2493_v18 = vld [vmem:[%s2871_s25 + $0x93] sm:$0xff] }
 0x12b   : > { %1436 = vrot.lane.b32.xlu1 %v2901_v7, %s2799_s8  ;;  %1277 = vrot.lane.b32.xlu0 %v3049_v40, %s2798_s3  ;;  %v4038_v7 = vld [vmem:[#allocation6_spill] sm:$0xff] }
 0x12d   : > { %v694_v23 = vpop.permute.xlu1 %693  ;;  %v692_v57 = vpop.permute.xlu0 %691 }
 0x12e   : > { %773 = vst.msk [vmem:[#allocation2 + $0x88] sm:$0xff] %vm755_vm3, %v694_v23  ;;  %772 = vst.msk [vmem:[#allocation2 + $0x80] sm:$0xff] %vm755_vm3, %v692_v57 }
 0x12f   : > { %892 = vrot.lane.b32.xlu1 %v4037_v22, %s2796_s29  ;;  %1468 = vrot.lane.b32.xlu0 %v4037_v22, %s2799_s8 }
 0x131   : > { %v698_v28 = vpop.permute.xlu1 %697  ;;  %v696_v31 = vpop.permute.xlu0 %695 }
 0x132   : > { %775 = vst.msk [vmem:[#allocation2 + $0x98] sm:$0xff] %vm755_vm3, %v698_v28  ;;  %774 = vst.msk [vmem:[#allocation2 + $0x90] sm:$0xff] %vm755_vm3, %v696_v31 }
 0x133   : > { %1470 = vrot.lane.b32.xlu1 %v4038_v7, %s2799_s8  ;;  %1438 = vrot.lane.b32.xlu0 %v2458_v41, %s2799_s8  ;;  %v2494_v41 = vld [vmem:[%s2871_s25 + $0x9b] sm:$0xff] }
 0x135   : > { %v702_v40 = vpop.permute.xlu1 %701  ;;  %v700_v0 = vpop.permute.xlu0 %699 }
 0x136   : > { %777 = vst.msk [vmem:[#allocation2 + $0xa8] sm:$0xff] %vm755_vm3, %v702_v40  ;;  %776 = vst.msk [vmem:[#allocation2 + $0xa0] sm:$0xff] %vm755_vm3, %v700_v0 }
 0x137   : > { %1661 = vrot.lane.b32.xlu1 %v4039_v2, %s2800_s5  ;;  %1629 = vrot.lane.b32.xlu0 %v4040_v32, %s2800_s5 }
 0x139   : > { %v706_v33 = vpop.permute.xlu1 %705  ;;  %v704_v6 = vpop.permute.xlu0 %703 }
 0x13a   : > { %779 = vst.msk [vmem:[#allocation2 + $0xb8] sm:$0xff] %vm755_vm3, %v706_v33  ;;  %778 = vst.msk [vmem:[#allocation2 + $0xb0] sm:$0xff] %vm755_vm3, %v704_v6 }
 0x13b   : > { %1053 = vrot.lane.b32.xlu1 %v4040_v32, %s2797_s30  ;;  %894 = vrot.lane.b32.xlu0 %v4038_v7, %s2796_s29  ;;  %v2510_v7 = vld [vmem:[%s2871_s25 + $0x15b] sm:$0xff] }
 0x13d   : > { %v710_v34 = vpop.permute.xlu1 %709  ;;  %v708_v8 = vpop.permute.xlu0 %707 }
 0x13e   : > { %781 = vst.msk [vmem:[#allocation2 + $0xc8] sm:$0xff] %vm755_vm3, %v710_v34  ;;  %780 = vst.msk [vmem:[#allocation2 + $0xc0] sm:$0xff] %vm755_vm3, %v708_v8  ;;  %v2432_v8 = vld [vmem:[%s2871_s25 + $0xb1] sm:$0xff] }
 0x13f   : > { %1631 = vrot.lane.b32.xlu1 %v4041_v9, %s2800_s5  ;;  %1085 = vrot.lane.b32.xlu0 %v4039_v2, %s2797_s30  ;;  %v2431_v2 = vld [vmem:[%s2871_s25 + $0xa9] sm:$0xff] }
 0x141   : > { %v714_v10 = vpop.permute.xlu1 %713  ;;  %v712_v11 = vpop.permute.xlu0 %711 }
 0x142   : > { %783 = vst.msk [vmem:[#allocation2 + $0xd8] sm:$0xff] %vm755_vm3, %v714_v10  ;;  %782 = vst.msk [vmem:[#allocation2 + $0xd0] sm:$0xff] %vm755_vm3, %v712_v11  ;;  %v2463_v11 = vld [vmem:[%s2871_s25 + $0xaa] sm:$0xff] }
 0x143   : > { %1055 = vrot.lane.b32.xlu1 %v4041_v9, %s2797_s30  ;;  %1663 = vrot.lane.b32.xlu0 %v4042_v14, %s2800_s5 }
 0x145   : > { %v718_v15 = vpop.permute.xlu1 %717  ;;  %v716_v21 = vpop.permute.xlu0 %715 }
 0x146   : > { %785 = vst.msk [vmem:[#allocation2 + $0xe8] sm:$0xff] %vm755_vm3, %v718_v15  ;;  %784 = vst.msk [vmem:[#allocation2 + $0xe0] sm:$0xff] %vm755_vm3, %v716_v21 }
 0x147   : > { %1247 = vrot.lane.b32.xlu1 %v2977_v25, %s2798_s3  ;;  %1087 = vrot.lane.b32.xlu0 %v4042_v14, %s2797_s30  ;;  %v2459_v25 = vld [vmem:[%s2871_s25 + $0x7a] sm:$0xff] }
 0x149   : > { %v722_v43 = vpop.permute.xlu1 %721  ;;  %v720_v42 = vpop.permute.xlu0 %719 }
 0x14a   : > { %787 = vst.msk [vmem:[#allocation2 + $0xf8] sm:$0xff] %vm755_vm3, %v722_v43  ;;  %786 = vst.msk [vmem:[#allocation2 + $0xf0] sm:$0xff] %vm755_vm3, %v720_v42  ;;  %v2385_v43 = vld [vmem:[%s2871_s25 + $0x16a] sm:$0xff] }
 0x14b   : > { %1249 = vrot.lane.b32.xlu1 %v2974_v24, %s2798_s3  ;;  %1279 = vrot.lane.b32.xlu0 %v3072_v45, %s2798_s3  ;;  %v2381_v24 = vld [vmem:[%s2871_s25 + $0x13a] sm:$0xff]  ;;  %v2476_v45 = vld [vmem:[%s2871_s25 + $0x142] sm:$0xff] }
 0x14d   : > { %v855_v17 = vpop.permute.xlu1 %854  ;;  %v853_v13 = vpop.permute.xlu0 %852 }
 0x14e   : > { %950 = vst.msk [vmem:[#allocation2 + $0x8] sm:$0xff] %vm948_vm4, %v855_v17  ;;  %949 = vst.msk [vmem:[#allocation2] sm:$0xff] %vm948_vm4, %v853_v13  ;;  %v2480_v17 = vld [vmem:[%s2871_s25 + $0x172] sm:$0xff] }
 0x14f   : > { %1440 = vrot.lane.b32.xlu1 %v2459_v25, %s2799_s8  ;;  %1281 = vrot.lane.b32.xlu0 %v3069_v44, %s2798_s3  ;;  %v2491_v44 = vld [vmem:[%s2871_s25 + $0x7b] sm:$0xff]  ;;  %v2464_v13 = vld [vmem:[%s2871_s25 + $0xb2] sm:$0xff] }
 0x151   : > { %v859_v20 = vpop.permute.xlu1 %858  ;;  %v857_v58 = vpop.permute.xlu0 %856 }
 0x152   : > { %952 = vst.msk [vmem:[#allocation2 + $0x18] sm:$0xff] %vm948_vm4, %v859_v20  ;;  %951 = vst.msk [vmem:[#allocation2 + $0x10] sm:$0xff] %vm948_vm4, %v857_v58  ;;  %v2511_v20 = vld [vmem:[%s2871_s25 + $0x16b] sm:$0xff] }
 0x153   : > { %896 = vrot.lane.b32.xlu1 %v2381_v24, %s2796_s29  ;;  %1472 = vrot.lane.b32.xlu0 %v2381_v24, %s2799_s8  ;;  %v2495_v58 = vld [vmem:[%s2871_s25 + $0xab] sm:$0xff] }
 0x155   : > { %v863_v19 = vpop.permute.xlu1 %862  ;;  %v861_v39 = vpop.permute.xlu0 %860 }
 0x156   : > { %954 = vst.msk [vmem:[#allocation2 + $0x28] sm:$0xff] %vm948_vm4, %v863_v19  ;;  %953 = vst.msk [vmem:[#allocation2 + $0x20] sm:$0xff] %vm948_vm4, %v861_v39 }
 0x157   : > { %1474 = vrot.lane.b32.xlu1 %v2476_v45, %s2799_s8  ;;  %1442 = vrot.lane.b32.xlu0 %v2460_v59, %s2799_s8 }
 0x159   : > { %v867_v35 = vpop.permute.xlu1 %866  ;;  %v865_v36 = vpop.permute.xlu0 %864 }
 0x15a   : > { %956 = vst.msk [vmem:[#allocation2 + $0x38] sm:$0xff] %vm948_vm4, %v867_v35  ;;  %955 = vst.msk [vmem:[#allocation2 + $0x30] sm:$0xff] %vm948_vm4, %v865_v36 }
 0x15b   : > { %1665 = vrot.lane.b32.xlu1 %v4043_v5, %s2800_s5  ;;  %1633 = vrot.lane.b32.xlu0 %v2491_v44, %s2800_s5 }
 0x15d   : > { %v871_v38 = vpop.permute.xlu1 %870  ;;  %v869_v37 = vpop.permute.xlu0 %868 }
 0x15e   : > { %958 = vst.msk [vmem:[#allocation2 + $0x48] sm:$0xff] %vm948_vm4, %v871_v38  ;;  %957 = vst.msk [vmem:[#allocation2 + $0x40] sm:$0xff] %vm948_vm4, %v869_v37 }
 0x15f   : > { %1057 = vrot.lane.b32.xlu1 %v2491_v44, %s2797_s30  ;;  %898 = vrot.lane.b32.xlu0 %v2476_v45, %s2796_s29  ;;  %v2496_v44 = vld [vmem:[%s2871_s25 + $0xb3] sm:$0xff] }
 0x161   : > { %v875_v62 = vpop.permute.xlu1 %874  ;;  %v873_v3 = vpop.permute.xlu0 %872 }
 0x162   : > { %960 = vst.msk [vmem:[#allocation2 + $0x58] sm:$0xff] %vm948_vm4, %v875_v62  ;;  %959 = vst.msk [vmem:[#allocation2 + $0x50] sm:$0xff] %vm948_vm4, %v873_v3 }
 0x163   : > { %1635 = vrot.lane.b32.xlu1 %v2492_v47, %s2800_s5  ;;  %1089 = vrot.lane.b32.xlu0 %v4043_v5, %s2797_s30  ;;  %v2512_v5 = vld [vmem:[%s2871_s25 + $0x173] sm:$0xff] }
 0x165   : > { %v885_v4 = vpop.permute.xlu1 %884  ;;  %v877_v16 = vpop.permute.xlu0 %876 }
 0x166   : > { %965 = vst.msk [vmem:[#allocation2 + $0x80] sm:$0xff] %vm948_vm4, %v885_v4  ;;  %961 = vst.msk [vmem:[#allocation2 + $0x60] sm:$0xff] %vm948_vm4, %v877_v16  ;;  %v2434_v16 = vld [vmem:[%s2871_s25 + $0xc9] sm:$0xff] }
 0x167   : > { %1059 = vrot.lane.b32.xlu1 %v2492_v47, %s2797_s30  ;;  %1667 = vrot.lane.b32.xlu0 %v2508_v12, %s2800_s5  ;;  %v2433_v47 = vld [vmem:[%s2871_s25 + $0xc1] sm:$0xff] }
 0x169   : > { %v1046_v55 = vpop.permute.xlu1 %1045  ;;  %v887_v1 = vpop.permute.xlu0 %886 }
 0x16a   : > { %1142 = vst.msk [vmem:[#allocation2] sm:$0xff] %vm1141_vm5, %v1046_v55  ;;  %v2449_v55 = vld [vmem:[%s2871_s25 + $0x181] sm:$0xff] }
 0x16b   : > { %966 = vst.msk [vmem:[#allocation2 + $0x88] sm:$0xff] %vm948_vm4, %v887_v1  ;;  %1251 = vrot.lane.b32.xlu1 %v2989_v27, %s2798_s3  ;;  %1091 = vrot.lane.b32.xlu0 %v2508_v12, %s2797_s30 }
 0x16d   : > { %v1048_v54 = vpop.permute.xlu1 %1047  ;;  %v1078_v50 = vpop.permute.xlu0 %1077 }
 0x16e   : > { %1143 = vst.msk [vmem:[#allocation2 + $0x8] sm:$0xff] %vm1141_vm5, %v1048_v54  ;;  %1158 = vst.msk [vmem:[#allocation2 + $0x80] sm:$0xff] %vm1141_vm5, %v1078_v50  ;;  %v2465_v50 = vld [vmem:[%s2871_s25 + $0xc2] sm:$0xff] }
 0x16f   : > { %1253 = vrot.lane.b32.xlu1 %v2986_v26, %s2798_s3  ;;  %1283 = vrot.lane.b32.xlu0 %v3092_v49, %s2798_s3 }
 0x171   : > { %v1240_v27 = vpop.permute.xlu1 %1239  ;;  %v1080_v46 = vpop.permute.xlu0 %1079 }
 0x172   : > { %1336 = vst.msk [vmem:[#allocation2] sm:$0xff] %vm1335_vm6, %v1240_v27 }
 0x173   : > { %1159 = vst.msk [vmem:[#allocation2 + $0x88] sm:$0xff] %vm1141_vm5, %v1080_v46  ;;  %1444 = vrot.lane.b32.xlu1 %v2461_v29, %s2799_s8  ;;  %1285 = vrot.lane.b32.xlu0 %v3089_v48, %s2798_s3  ;;  %v2509_v48 = vld [vmem:[%s2871_s25 + $0x153] sm:$0xff]  ;;  %v2450_v29 = vld [vmem:[%s2871_s25 + $0x189] sm:$0xff] }
 0x175   : > { %v1242_v26 = vpop.permute.xlu1 %1241  ;;  %v1272_v49 = vpop.permute.xlu0 %1271 }
 0x176   : > { %1337 = vst.msk [vmem:[#allocation2 + $0x8] sm:$0xff] %vm1335_vm6, %v1242_v26  ;;  %1352 = vst.msk [vmem:[#allocation2 + $0x80] sm:$0xff] %vm1335_vm6, %v1272_v49  ;;  %v2387_v26 = vld [vmem:[%s2871_s25 + $0x182] sm:$0xff] }
 0x177   : > { %900 = vrot.lane.b32.xlu1 %v2383_v30, %s2796_s29  ;;  %1476 = vrot.lane.b32.xlu0 %v2383_v30, %s2799_s8 }
 0x179   : > { %v1433_v61 = vpop.permute.xlu1 %1432  ;;  %v1274_v60 = vpop.permute.xlu0 %1273 }
 0x17a   : > { %1529 = vst.msk [vmem:[#allocation2] sm:$0xff] %vm1528_vm7, %v1433_v61  ;;  %v2482_v61 = vld [vmem:[%s2871_s25 + $0x18a] sm:$0xff] }
 0x17b   : > { %1353 = vst.msk [vmem:[#allocation2 + $0x88] sm:$0xff] %vm1335_vm6, %v1274_v60  ;;  %1478 = vrot.lane.b32.xlu1 %v2478_v63, %s2799_s8  ;;  %1446 = vrot.lane.b32.xlu0 %v2462_v51, %s2799_s8  ;;  %v2466_v60 = vld [vmem:[%s2871_s25 + $0xca] sm:$0xff] }
 0x17d   : > { %v889_v56 = vpop.permute.xlu1 %888  ;;  %v1465_v23 = vpop.permute.xlu0 %1464 }
 0x17e   : > { %967 = vst.msk [vmem:[#allocation2 + $0x90] sm:$0xff] %vm948_vm4, %v889_v56  ;;  %v2513_v56 = vld [vmem:[%s2871_s25 + $0x183] sm:$0xff] }
 0x17f   : > { %1545 = vst.msk [vmem:[#allocation2 + $0x80] sm:$0xff] %vm1528_vm7, %v1465_v23  ;;  %1669 = vrot.lane.b32.xlu1 %v2509_v48, %s2800_s5  ;;  %1637 = vrot.lane.b32.xlu0 %v2493_v18, %s2800_s5  ;;  %v2497_v23 = vld [vmem:[%s2871_s25 + $0xc3] sm:$0xff] }
 0x181   : > { %v1467_v57 = vpop.permute.xlu1 %1466  ;;  %v1435_v22 = vpop.permute.xlu0 %1434 }
 0x182   : > { %1546 = vst.msk [vmem:[#allocation2 + $0x88] sm:$0xff] %vm1528_vm7, %v1467_v57  ;;  %1530 = vst.msk [vmem:[#allocation2 + $0x8] sm:$0xff] %vm1528_vm7, %v1435_v22 }
 0x183   : > { %1061 = vrot.lane.b32.xlu1 %v2493_v18, %s2797_s30  ;;  %902 = vrot.lane.b32.xlu0 %v2478_v63, %s2796_s29 }
 0x185   : > { %v1658_v28 = vpop.permute.xlu1 %1657  ;;  %v1626_v31 = vpop.permute.xlu0 %1625 }
 0x186   : > { %1738 = vst.msk [vmem:[#allocation2 + $0x80] sm:$0xff] %vm1721_vm8, %v1658_v28  ;;  %1722 = vst.msk [vmem:[#allocation2] sm:$0xff] %vm1721_vm8, %v1626_v31 }
 0x187   : > { %1639 = vrot.lane.b32.xlu1 %v2494_v41, %s2800_s5  ;;  %1093 = vrot.lane.b32.xlu0 %v2509_v48, %s2797_s30 }
 0x189   : > { %v1050_v40 = vpop.permute.xlu1 %1049  ;;  %v891_v0 = vpop.permute.xlu0 %890 }
 0x18a   : > { %1144 = vst.msk [vmem:[#allocation2 + $0x10] sm:$0xff] %vm1141_vm5, %v1050_v40  ;;  %v2514_v40 = vld [vmem:[%s2871_s25 + $0x18b] sm:$0xff] }
 0x18b   : > { %968 = vst.msk [vmem:[#allocation2 + $0x98] sm:$0xff] %vm948_vm4, %v891_v0  ;;  %1063 = vrot.lane.b32.xlu1 %v2494_v41, %s2797_s30  ;;  %1671 = vrot.lane.b32.xlu0 %v2510_v7, %s2800_s5  ;;  %v2498_v0 = vld [vmem:[%s2871_s25 + $0xcb] sm:$0xff] }
 0x18d   : > { %v1628_v32 = vpop.permute.xlu1 %1627  ;;  %v1082_v33 = vpop.permute.xlu0 %1081  ;;  %v1754_v6 = vld [vmem:[#allocation2] sm:$0xff] }
 0x18e   : > { %v1770_v34 = vld [vmem:[#allocation2 + $0x80] sm:$0xff]  ;;  %1723 = vst.msk [vmem:[#allocation2 + $0x8] sm:$0xff] %vm1721_vm8, %v1628_v32  ;;  %2616 = vmatprep.mubr.msk.f32.mxu0 %vm1795_vm9, %v1754_v6 }
 0x18f   : > { %1160 = vst.msk [vmem:[#allocation2 + $0x90] sm:$0xff] %vm1141_vm5, %v1082_v33  ;;  %2640 = vmatprep.mubr.msk.f32.mxu1 %vm1795_vm9, %v1770_v34  ;;  %1255 = vrot.lane.b32.xlu1 %v2431_v2, %s2798_s3 }
 0x190   : > { %1095 = vrot.lane.b32.xlu0 %v2510_v7, %s2797_s30 }
 0x191   : > { %v1052_v9 = vpop.permute.xlu1 %1051  ;;  %v1660_v10 = vpop.permute.xlu0 %1659 }
 0x192   : > { %1145 = vst.msk [vmem:[#allocation2 + $0x18] sm:$0xff] %vm1141_vm5, %v1052_v9  ;;  %v2451_v9 = vld [vmem:[%s2871_s25 + $0x199] sm:$0xff] }
 0x193   : > { %1739 = vst.msk [vmem:[#allocation2 + $0x88] sm:$0xff] %vm1721_vm8, %v1660_v10  ;;  %1257 = vrot.lane.b32.xlu1 %v2432_v8, %s2798_s3  ;;  %v2435_v10 = vld [vmem:[%s2871_s25 + $0xd9] sm:$0xff] }
 0x194   : > { %1287 = vrot.lane.b32.xlu0 %v3112_v53, %s2798_s3 }
 0x195   : > { %v1244_v14 = vpop.permute.xlu1 %1243  ;;  %v1084_v15 = vpop.permute.xlu0 %1083  ;;  %v1755_v21 = vld [vmem:[#allocation2 + $0x8] sm:$0xff] }
 0x196   : > { %1338 = vst.msk [vmem:[#allocation2 + $0x10] sm:$0xff] %vm1335_vm6, %v1244_v14  ;;  %2617 = vmatmul.mubr.msk.f32.vlgmr.msra.gmra.mxu0 %vm1795_vm9, %v1755_v21  ;;  %v2436_v21 = vld [vmem:[%s2871_s25 + $0xe1] sm:$0xff] }
 0x197   : > { %1161 = vst.msk [vmem:[#allocation2 + $0x98] sm:$0xff] %vm1141_vm5, %v1084_v15  ;;  %1448 = vrot.lane.b32.xlu1 %v2463_v11, %s2799_s8  ;;  %v2452_v15 = vld [vmem:[%s2871_s25 + $0x1a1] sm:$0xff] }
 0x198   : > { %1289 = vrot.lane.b32.xlu0 %v3109_v52, %s2798_s3 }
 0x199   : > { %v1246_v42 = vpop.permute.xlu1 %1245  ;;  %v1276_v53 = vpop.permute.xlu0 %1275 }
 0x19a   : > { %v1771_v25 = vld [vmem:[#allocation2 + $0x88] sm:$0xff]  ;;  %1339 = vst.msk [vmem:[#allocation2 + $0x18] sm:$0xff] %vm1335_vm6, %v1246_v42  ;;  %1354 = vst.msk [vmem:[#allocation2 + $0x90] sm:$0xff] %vm1335_vm6, %v1276_v53 }
 0x19b   : > { %2641 = vmatmul.mubr.msk.f32.vlgmr.msra.gmra.mxu1 %vm1795_vm9, %v1771_v25  ;;  %904 = vrot.lane.b32.xlu1 %v2385_v43, %s2796_s29  ;;  %v2483_v25 = vld [vmem:[%s2871_s25 + $0x19a] sm:$0xff] }
 0x19c   : > { %1480 = vrot.lane.b32.xlu0 %v2385_v43, %s2799_s8 }
 0x19d   : > { %v1437_v24 = vpop.permute.xlu1 %1436  ;;  %v1278_v52 = vpop.permute.xlu0 %1277 }
 0x19e   : > { %1531 = vst.msk [vmem:[#allocation2 + $0x10] sm:$0xff] %vm1528_vm7, %v1437_v24 }
 0x19f   : > { %1355 = vst.msk [vmem:[#allocation2 + $0x98] sm:$0xff] %vm1335_vm6, %v1278_v52  ;;  %1482 = vrot.lane.b32.xlu1 %v2480_v17, %s2799_s8 }
 0x1a0   : > { %1450 = vrot.lane.b32.xlu0 %v2464_v13, %s2799_s8 }
 0x1a1   : > { %v893_v45 = vpop.permute.xlu1 %892  ;;  %v1469_v59 = vpop.permute.xlu0 %1468 }
 0x1a2   : > { %969 = vst.msk [vmem:[#allocation2 + $0xa0] sm:$0xff] %vm948_vm4, %v893_v45  ;;  %v2484_v45 = vld [vmem:[%s2871_s25 + $0x1a2] sm:$0xff] }
 0x1a3   : > { %1547 = vst.msk [vmem:[#allocation2 + $0x90] sm:$0xff] %vm1528_vm7, %v1469_v59  ;;  %1673 = vrot.lane.b32.xlu1 %v2511_v20, %s2800_s5  ;;  %v2468_v59 = vld [vmem:[%s2871_s25 + $0xe2] sm:$0xff] }
 0x1a4   : > { %1641 = vrot.lane.b32.xlu0 %v2495_v58, %s2800_s5 }
 0x1a5   : > { %v1471_v19 = vpop.permute.xlu1 %1470  ;;  %v1439_v39 = vpop.permute.xlu0 %1438 }
 0x1a6   : > { %1548 = vst.msk [vmem:[#allocation2 + $0x98] sm:$0xff] %vm1528_vm7, %v1471_v19  ;;  %1532 = vst.msk [vmem:[#allocation2 + $0x18] sm:$0xff] %vm1528_vm7, %v1439_v39 }
 0x1a7   : > { %1065 = vrot.lane.b32.xlu1 %v2495_v58, %s2797_s30 }
 0x1a8   : > { %906 = vrot.lane.b32.xlu0 %v2480_v17, %s2796_s29  ;;  %v2467_v17 = vld [vmem:[%s2871_s25 + $0xda] sm:$0xff] }
 0x1a9   : > { %v1662_v35 = vpop.permute.xlu1 %1661  ;;  %v1630_v36 = vpop.permute.xlu0 %1629 }
 0x1aa   : > { %1740 = vst.msk [vmem:[#allocation2 + $0x90] sm:$0xff] %vm1721_vm8, %v1662_v35  ;;  %1724 = vst.msk [vmem:[#allocation2 + $0x10] sm:$0xff] %vm1721_vm8, %v1630_v36  ;;  %v2499_v35 = vld [vmem:[%s2871_s25 + $0xdb] sm:$0xff] }
 0x1ab   : > { %1643 = vrot.lane.b32.xlu1 %v2496_v44, %s2800_s5 }
 0x1ac   : > { %1097 = vrot.lane.b32.xlu0 %v2511_v20, %s2797_s30 }
 0x1ad   : > { %v1054_v38 = vpop.permute.xlu1 %1053  ;;  %v895_v37 = vpop.permute.xlu0 %894 }
 0x1ae   : > { %1146 = vst.msk [vmem:[#allocation2 + $0x20] sm:$0xff] %vm1141_vm5, %v1054_v38 }
 0x1af   : > { %970 = vst.msk [vmem:[#allocation2 + $0xa8] sm:$0xff] %vm948_vm4, %v895_v37  ;;  %1067 = vrot.lane.b32.xlu1 %v2496_v44, %s2797_s30  ;;  %v2515_v44 = vld [vmem:[%s2871_s25 + $0x19b] sm:$0xff] }
 0x1b0   : > { %1675 = vrot.lane.b32.xlu0 %v2512_v5, %s2800_s5 }
 0x1b1   : > { %v1632_v62 = vpop.permute.xlu1 %1631  ;;  %v1086_v3 = vpop.permute.xlu0 %1085  ;;  %v1756_v12 = vld [vmem:[#allocation2 + $0x10] sm:$0xff] }
 0x1b2   : > { %v1772_v4 = vld [vmem:[#allocation2 + $0x90] sm:$0xff]  ;;  %1725 = vst.msk [vmem:[#allocation2 + $0x18] sm:$0xff] %vm1721_vm8, %v1632_v62  ;;  %2619 = vmatprep.mubr.msk.f32.mxu0 %vm1795_vm9, %v1756_v12  ;;  %v2500_v12 = vld [vmem:[%s2871_s25 + $0xe3] sm:$0xff] }
 0x1b3   : > { %1162 = vst.msk [vmem:[#allocation2 + $0xa0] sm:$0xff] %vm1141_vm5, %v1086_v3  ;;  %2643 = vmatprep.mubr.msk.f32.mxu1 %vm1795_vm9, %v1772_v4  ;;  %1259 = vrot.lane.b32.xlu1 %v2433_v47, %s2798_s3  ;;  %v2516_v3 = vld [vmem:[%s2871_s25 + $0x1a3] sm:$0xff] }
 0x1b4   : > { %1099 = vrot.lane.b32.xlu0 %v2512_v5, %s2797_s30 }
 0x1b5   : > { %v1056_v1 = vpop.permute.xlu1 %1055  ;;  %v1664_v54 = vpop.permute.xlu0 %1663 }
 0x1b6   : > { %1147 = vst.msk [vmem:[#allocation2 + $0x28] sm:$0xff] %vm1141_vm5, %v1056_v1 }
 0x1b7   : > { %1741 = vst.msk [vmem:[#allocation2 + $0x98] sm:$0xff] %vm1721_vm8, %v1664_v54  ;;  %1261 = vrot.lane.b32.xlu1 %v2434_v16, %s2798_s3 }
 0x1b8   : > { %1291 = vrot.lane.b32.xlu0 %v2449_v55, %s2798_s3 }
 0x1b9   : > { %v1248_v27 = vpop.permute.xlu1 %1247  ;;  %v1088_v46 = vpop.permute.xlu0 %1087  ;;  %v1757_v30 = vld [vmem:[#allocation2 + $0x18] sm:$0xff] }
 0x1ba   : > { %1340 = vst.msk [vmem:[#allocation2 + $0x20] sm:$0xff] %vm1335_vm6, %v1248_v27  ;;  %2620 = vmatmul.mubr.msk.f32.gmra.mxu0 %vm1795_vm9, %v1757_v30  ;;  %v2437_v27 = vld [vmem:[%s2871_s25 + $0xf1] sm:$0xff] }
 0x1bb   : > { %1163 = vst.msk [vmem:[#allocation2 + $0xa8] sm:$0xff] %vm1141_vm5, %v1088_v46  ;;  %1452 = vrot.lane.b32.xlu1 %v2465_v50, %s2799_s8 }
 0x1bc   : > { %1293 = vrot.lane.b32.xlu0 %v2450_v29, %s2798_s3  ;;  %v2453_v29 = vld [vmem:[%s2871_s25 + $0x1b1] sm:$0xff] }
 0x1bd   : > { %v1250_v49 = vpop.permute.xlu1 %1249  ;;  %v1280_v63 = vpop.permute.xlu0 %1279 }
 0x1be   : > { %v1773_v51 = vld [vmem:[#allocation2 + $0x98] sm:$0xff]  ;;  %1341 = vst.msk [vmem:[#allocation2 + $0x28] sm:$0xff] %vm1335_vm6, %v1250_v49  ;;  %1356 = vst.msk [vmem:[#allocation2 + $0xa0] sm:$0xff] %vm1335_vm6, %v1280_v63 }
 0x1bf   : > { %2644 = vmatmul.mubr.msk.f32.gmra.mxu1 %vm1795_vm9, %v1773_v51  ;;  %908 = vrot.lane.b32.xlu1 %v2387_v26, %s2796_s29  ;;  %v2454_v49 = vld [vmem:[%s2871_s25 + $0x1b9] sm:$0xff] }
 0x1c0   : > { %1484 = vrot.lane.b32.xlu0 %v2387_v26, %s2799_s8  ;;  %v2438_v63 = vld [vmem:[%s2871_s25 + $0xf9] sm:$0xff] }
 0x1c1   : > { %v1441_v48 = vpop.permute.xlu1 %1440  ;;  %v1282_v18 = vpop.permute.xlu0 %1281 }
 0x1c2   : > { %1533 = vst.msk [vmem:[#allocation2 + $0x20] sm:$0xff] %vm1528_vm7, %v1441_v48  ;;  %v2485_v48 = vld [vmem:[%s2871_s25 + $0x1b2] sm:$0xff] }
 0x1c3   : > { %1357 = vst.msk [vmem:[#allocation2 + $0xa8] sm:$0xff] %vm1335_vm6, %v1282_v18  ;;  %1486 = vrot.lane.b32.xlu1 %v2482_v61, %s2799_s8  ;;  %v2469_v18 = vld [vmem:[%s2871_s25 + $0xf2] sm:$0xff] }
 0x1c4   : > { %1454 = vrot.lane.b32.xlu0 %v2466_v60, %s2799_s8 }
 0x1c5   : > { %v897_v57 = vpop.permute.xlu1 %896  ;;  %v1473_v22 = vpop.permute.xlu0 %1472 }
 0x1c6   : > { %971 = vst.msk [vmem:[#allocation2 + $0xb0] sm:$0xff] %vm948_vm4, %v897_v57  ;;  %v2486_v57 = vld [vmem:[%s2871_s25 + $0x1ba] sm:$0xff] }
 0x1c7   : > { %1549 = vst.msk [vmem:[#allocation2 + $0xa0] sm:$0xff] %vm1528_vm7, %v1473_v22  ;;  %1677 = vrot.lane.b32.xlu1 %v2513_v56, %s2800_s5  ;;  %v2470_v22 = vld [vmem:[%s2871_s25 + $0xfa] sm:$0xff] }
 0x1c8   : > { %1645 = vrot.lane.b32.xlu0 %v2497_v23, %s2800_s5 }
 0x1c9   : > { %v1475_v41 = vpop.permute.xlu1 %1474  ;;  %v1443_v28 = vpop.permute.xlu0 %1442 }
 0x1ca   : > { %1550 = vst.msk [vmem:[#allocation2 + $0xa8] sm:$0xff] %vm1528_vm7, %v1475_v41  ;;  %1534 = vst.msk [vmem:[#allocation2 + $0x28] sm:$0xff] %vm1528_vm7, %v1443_v28 }
 0x1cb   : > { %910 = vrot.lane.b32.xlu1 %v2482_v61, %s2796_s29 }
 0x1cc   : > { %878 = vrot.lane.b32.xlu0 %v2466_v60, %s2796_s29 }
 0x1cd   : > { %v1666_v31 = vpop.permute.xlu1 %1665  ;;  %v1634_v7 = vpop.permute.xlu0 %1633 }
 0x1ce   : > { %1742 = vst.msk [vmem:[#allocation2 + $0xa0] sm:$0xff] %vm1721_vm8, %v1666_v31  ;;  %1726 = vst.msk [vmem:[#allocation2 + $0x20] sm:$0xff] %vm1721_vm8, %v1634_v7  ;;  %v2517_v31 = vld [vmem:[%s2871_s25 + $0x1b3] sm:$0xff] }
 0x1cf   : > { %1101 = vrot.lane.b32.xlu1 %v2513_v56, %s2797_s30  ;;  %v2501_v7 = vld [vmem:[%s2871_s25 + $0xf3] sm:$0xff] }
 0x1d0   : > { %1069 = vrot.lane.b32.xlu0 %v2497_v23, %s2797_s30 }
 0x1d1   : > { %v1058_v2 = vpop.permute.xlu1 %1057  ;;  %v899_v32 = vpop.permute.xlu0 %898 }
 0x1d2   : > { %1148 = vst.msk [vmem:[#allocation2 + $0x30] sm:$0xff] %vm1141_vm5, %v1058_v2  ;;  %v2518_v2 = vld [vmem:[%s2871_s25 + $0x1bb] sm:$0xff] }
 0x1d3   : > { %972 = vst.msk [vmem:[#allocation2 + $0xb8] sm:$0xff] %vm948_vm4, %v899_v32  ;;  %1679 = vrot.lane.b32.xlu1 %v2514_v40, %s2800_s5  ;;  %v2502_v32 = vld [vmem:[%s2871_s25 + $0xfb] sm:$0xff]  ;;  %s134_s25 = sand.u32 1, %s2783_s10  }
 0x1d4   : > { %1647 = vrot.lane.b32.xlu0 %v2498_v0, %s2800_s5 }
 0x1d5   : > { %v1636_v33 = vpop.permute.xlu1 %1635  ;;  %v1090_v6 = vpop.permute.xlu0 %1089  ;;  %v1758_v34 = vld [vmem:[#allocation2 + $0x20] sm:$0xff] }
 0x1d6   : > { %v1774_v8 = vld [vmem:[#allocation2 + $0xa0] sm:$0xff]  ;;  %1727 = vst.msk [vmem:[#allocation2 + $0x28] sm:$0xff] %vm1721_vm8, %v1636_v33  ;;  %2622 = vmatprep.mubr.msk.f32.mxu0 %vm1795_vm9, %v1758_v34 }
 0x1d7   : > { %1164 = vst.msk [vmem:[#allocation2 + $0xb0] sm:$0xff] %vm1141_vm5, %v1090_v6  ;;  %2646 = vmatprep.mubr.msk.f32.mxu1 %vm1795_vm9, %v1774_v8  ;;  %1103 = vrot.lane.b32.xlu1 %v2514_v40, %s2797_s30 }
 0x1d8   : > { %1071 = vrot.lane.b32.xlu0 %v2498_v0, %s2797_s30 }
 0x1d9   : > { %v1060_v11 = vpop.permute.xlu1 %1059  ;;  %v1668_v14 = vpop.permute.xlu0 %1667 }
 0x1da   : > { %1149 = vst.msk [vmem:[#allocation2 + $0x38] sm:$0xff] %vm1141_vm5, %v1060_v11 }
 0x1db   : > { %1743 = vst.msk [vmem:[#allocation2 + $0xa8] sm:$0xff] %vm1721_vm8, %v1668_v14  ;;  %1295 = vrot.lane.b32.xlu1 %v2451_v9, %s2798_s3 }
 0x1dc   : > { %1263 = vrot.lane.b32.xlu0 %v2435_v10, %s2798_s3 }
 0x1dd   : > { %v1252_v43 = vpop.permute.xlu1 %1251  ;;  %v1092_v42 = vpop.permute.xlu0 %1091  ;;  %v1759_v53 = vld [vmem:[#allocation2 + $0x28] sm:$0xff] }
 0x1de   : > { %1342 = vst.msk [vmem:[#allocation2 + $0x30] sm:$0xff] %vm1335_vm6, %v1252_v43  ;;  %2623 = vmatmul.mubr.msk.f32.gmra.mxu0 %vm1795_vm9, %v1759_v53 }
 0x1df   : > { %1165 = vst.msk [vmem:[#allocation2 + $0xb8] sm:$0xff] %vm1141_vm5, %v1092_v42  ;;  %1297 = vrot.lane.b32.xlu1 %v2452_v15, %s2798_s3 }
 0x1e0   : > { %1265 = vrot.lane.b32.xlu0 %v2436_v21, %s2798_s3 }
 0x1e1   : > { %v1254_v13 = vpop.permute.xlu1 %1253  ;;  %v1284_v24 = vpop.permute.xlu0 %1283 }
 0x1e2   : > { %v1775_v52 = vld [vmem:[#allocation2 + $0xa8] sm:$0xff]  ;;  %1343 = vst.msk [vmem:[#allocation2 + $0x38] sm:$0xff] %vm1335_vm6, %v1254_v13  ;;  %1358 = vst.msk [vmem:[#allocation2 + $0xb0] sm:$0xff] %vm1335_vm6, %v1284_v24 }
 0x1e3   : > { %2647 = vmatmul.mubr.msk.f32.gmra.mxu1 %vm1795_vm9, %v1775_v52  ;;  %1488 = vrot.lane.b32.xlu1 %v2483_v25, %s2799_s8 }
 0x1e4   : > { %1456 = vrot.lane.b32.xlu0 %v2467_v17, %s2799_s8 }
 0x1e5   : > { %v1445_v20 = vpop.permute.xlu1 %1444  ;;  %v1286_v58 = vpop.permute.xlu0 %1285 }
 0x1e6   : > { %1535 = vst.msk [vmem:[#allocation2 + $0x30] sm:$0xff] %vm1528_vm7, %v1445_v20 }
 0x1e7   : > { %1359 = vst.msk [vmem:[#allocation2 + $0xb8] sm:$0xff] %vm1335_vm6, %v1286_v58  ;;  %912 = vrot.lane.b32.xlu1 %v2483_v25, %s2796_s29 }
 0x1e8   : > { %880 = vrot.lane.b32.xlu0 %v2467_v17, %s2796_s29 }
 0x1e9   : > { %v901_v19 = vpop.permute.xlu1 %900  ;;  %v1477_v39 = vpop.permute.xlu0 %1476 }
 0x1ea   : > { %973 = vst.msk [vmem:[#allocation2 + $0xc0] sm:$0xff] %vm948_vm4, %v901_v19 }
 0x1eb   : > { %1551 = vst.msk [vmem:[#allocation2 + $0xb0] sm:$0xff] %vm1528_vm7, %v1477_v39  ;;  %1490 = vrot.lane.b32.xlu1 %v2484_v45, %s2799_s8 }
 0x1ec   : > { %1458 = vrot.lane.b32.xlu0 %v2468_v59, %s2799_s8 }
 0x1ed   : > { %v1479_v36 = vpop.permute.xlu1 %1478  ;;  %v1447_v5 = vpop.permute.xlu0 %1446 }
 0x1ee   : > { %1552 = vst.msk [vmem:[#allocation2 + $0xb8] sm:$0xff] %vm1528_vm7, %v1479_v36  ;;  %1536 = vst.msk [vmem:[#allocation2 + $0x38] sm:$0xff] %vm1528_vm7, %v1447_v5 }
 0x1ef   : > { %1681 = vrot.lane.b32.xlu1 %v2515_v44, %s2800_s5 }
 0x1f0   : > { %1649 = vrot.lane.b32.xlu0 %v2499_v35, %s2800_s5 }
 0x1f1   : > { %v1670_v38 = vpop.permute.xlu1 %1669  ;;  %v1638_v37 = vpop.permute.xlu0 %1637 }
 0x1f2   : > { %1744 = vst.msk [vmem:[#allocation2 + $0xb0] sm:$0xff] %vm1721_vm8, %v1670_v38  ;;  %1728 = vst.msk [vmem:[#allocation2 + $0x30] sm:$0xff] %vm1721_vm8, %v1638_v37 }
 0x1f3   : > { %914 = vrot.lane.b32.xlu1 %v2484_v45, %s2796_s29 }
 0x1f4   : > { %882 = vrot.lane.b32.xlu0 %v2468_v59, %s2796_s29  ;;  %s2229_s29 = sshll.u32 %s134_s25, 8 }
 0x1f5   : > { %v1062_v47 = vpop.permute.xlu1 %1061  ;;  %v903_v62 = vpop.permute.xlu0 %902 }
 0x1f6   : > { %1150 = vst.msk [vmem:[#allocation2 + $0x40] sm:$0xff] %vm1141_vm5, %v1062_v47 }
 0x1f7   : > { %974 = vst.msk [vmem:[#allocation2 + $0xc8] sm:$0xff] %vm948_vm4, %v903_v62  ;;  %1105 = vrot.lane.b32.xlu1 %v2515_v44, %s2797_s30 }
 0x1f8   : > { %1073 = vrot.lane.b32.xlu0 %v2499_v35, %s2797_s30 }
 0x1f9   : > { %v1640_v4 = vpop.permute.xlu1 %1639  ;;  %v1094_v16 = vpop.permute.xlu0 %1093  ;;  %v1760_v55 = vld [vmem:[#allocation2 + $0x30] sm:$0xff] }
 0x1fa   : > { %v1776_v1 = vld [vmem:[#allocation2 + $0xb0] sm:$0xff]  ;;  %1729 = vst.msk [vmem:[#allocation2 + $0x38] sm:$0xff] %vm1721_vm8, %v1640_v4  ;;  %2625 = vmatprep.mubr.msk.f32.mxu0 %vm1795_vm9, %v1760_v55 }
 0x1fb   : > { %1166 = vst.msk [vmem:[#allocation2 + $0xc0] sm:$0xff] %vm1141_vm5, %v1094_v16  ;;  %2649 = vmatprep.mubr.msk.f32.mxu1 %vm1795_vm9, %v1776_v1  ;;  %1683 = vrot.lane.b32.xlu1 %v2516_v3, %s2800_s5 }
 0x1fc   : > { %1651 = vrot.lane.b32.xlu0 %v2500_v12, %s2800_s5 }
 0x1fd   : > { %v1064_v54 = vpop.permute.xlu1 %1063  ;;  %v1672_v50 = vpop.permute.xlu0 %1671 }
 0x1fe   : > { %1151 = vst.msk [vmem:[#allocation2 + $0x48] sm:$0xff] %vm1141_vm5, %v1064_v54 }
 0x1ff   : > { %1745 = vst.msk [vmem:[#allocation2 + $0xb8] sm:$0xff] %vm1721_vm8, %v1672_v50  ;;  %1107 = vrot.lane.b32.xlu1 %v2516_v3, %s2797_s30 }
 0x200   : > { %1075 = vrot.lane.b32.xlu0 %v2500_v12, %s2797_s30  ;;  %s3887_s30 = scalar_lea.vmem [#allocation3], %s2229_s29 }
 0x201   : > { %v1256_v46 = vpop.permute.xlu1 %1255  ;;  %v1761_v26 = vld [vmem:[#allocation2 + $0x38] sm:$0xff] }
 0x202   : > { %v1096_v30 = vpop.permute.xlu0 %1095  ;;  %1344 = vst.msk [vmem:[#allocation2 + $0x40] sm:$0xff] %vm1335_vm6, %v1256_v46  ;;  %2626 = vmatmul.mubr.msk.f32.gmra.mxu0 %vm1795_vm9, %v1761_v26 }
 0x203   : > { %1167 = vst.msk [vmem:[#allocation2 + $0xc8] sm:$0xff] %vm1141_vm5, %v1096_v30  ;;  %1299 = vrot.lane.b32.xlu1 %v2453_v29, %s2798_s3 }
 0x204   : > { %1267 = vrot.lane.b32.xlu0 %v2437_v27, %s2798_s3 }
 0x205   : > { %v1258_v51 = vpop.permute.xlu1 %1257 }
 0x206   : > { %v1288_v61 = vpop.permute.xlu0 %1287  ;;  %v1777_v60 = vld [vmem:[#allocation2 + $0xb8] sm:$0xff]  ;;  %1345 = vst.msk [vmem:[#allocation2 + $0x48] sm:$0xff] %vm1335_vm6, %v1258_v51 }
 0x207   : > { %1360 = vst.msk [vmem:[#allocation2 + $0xc0] sm:$0xff] %vm1335_vm6, %v1288_v61  ;;  %2650 = vmatmul.mubr.msk.f32.gmra.mxu1 %vm1795_vm9, %v1777_v60  ;;  %1301 = vrot.lane.b32.xlu1 %v2454_v49, %s2798_s3 }
 0x208   : > { %1269 = vrot.lane.b32.xlu0 %v2438_v63, %s2798_s3  ;;  %s2556_s3 = sshll.u32 %s2839_s13, 12  ;;  %s3966_s13 = scalar_lea.sflag [#allocation4], %s134_s25 }
 0x209   : > { %v1449_v56 = vpop.permute.xlu1 %1448  ;;  %s3956_s22 = scalar_lea.hbm %s4009_s2, %s2556_s3 }
 0x20a   : > { %v1290_v23 = vpop.permute.xlu0 %1289  ;;  %1537 = vst.msk [vmem:[#allocation2 + $0x40] sm:$0xff] %vm1528_vm7, %v1449_v56 }
 0x20b   : > { %1361 = vst.msk [vmem:[#allocation2 + $0xc8] sm:$0xff] %vm1335_vm6, %v1290_v23  ;;  %1492 = vrot.lane.b32.xlu1 %v2485_v48, %s2799_s8 }
 0x20c   : > { %1460 = vrot.lane.b32.xlu0 %v2469_v18, %s2799_s8 }
 0x20d   : > { %v905_v41 = vpop.permute.xlu1 %904 }
 0x20e   : > { %v1481_v28 = vpop.permute.xlu0 %1480  ;;  %975 = vst.msk [vmem:[#allocation2 + $0xd0] sm:$0xff] %vm948_vm4, %v905_v41 }
 0x20f   : > { %1553 = vst.msk [vmem:[#allocation2 + $0xc0] sm:$0xff] %vm1528_vm7, %v1481_v28  ;;  %1494 = vrot.lane.b32.xlu1 %v2486_v57, %s2799_s8 }
 0x210   : > { %1462 = vrot.lane.b32.xlu0 %v2470_v22, %s2799_s8  ;;  %s2163_s8 = sshll.u32 %s3887_s30, 4  ;;  %s3960_s8 = int_to_ptr.vmem [resolvable:$true] %s2163_s8 }
 0x211   : > { %v1483_v40 = vpop.permute.xlu1 %1482  ;;  %s2731_s23 = scalar_lea.vmem %s3960_s8, 4096  ;;  %p2738_p0 = scmp.lt.s32.totalorder %s3960_s8, %s2736_s27 }
 0x212   : > { %v1451_v0 = vpop.permute.xlu0 %1450  ;;  %1554 = vst.msk [vmem:[#allocation2 + $0xc8] sm:$0xff] %vm1528_vm7, %v1483_v40  ;;  %p2732_p11 = scmp.ne.s32.totalorder %s3960_s8, %s2731_s23  ;;  %p2739_p1 = scmp.lt.s32.totalorder %s2737_s28, %s2731_s23 }
 0x213   : > { %1538 = vst.msk [vmem:[#allocation2 + $0x48] sm:$0xff] %vm1528_vm7, %v1451_v0  ;;  %1685 = vrot.lane.b32.xlu1 %v2517_v31, %s2800_s5 }
 0x214   : > { %1653 = vrot.lane.b32.xlu0 %v2501_v7, %s2800_s5  ;;  %p2733_p12 = pnand %p2732_p11, %p2856_p5  ;;  %p2740_p2 = por %p2739_p1, %p2738_p0 }
 0x215   : > { %v1674_v33 = vpop.permute.xlu1 %1673 }
 0x216   : > { %v1642_v6 = vpop.permute.xlu0 %1641  ;;  %1746 = vst.msk [vmem:[#allocation2 + $0xc0] sm:$0xff] %vm1721_vm8, %v1674_v33  ;;  %p2734_p13 = pneg %p2733_p12 }
 0x217   : > { %1730 = vst.msk [vmem:[#allocation2 + $0x40] sm:$0xff] %vm1721_vm8, %v1642_v6  ;;  %1687 = vrot.lane.b32.xlu1 %v2518_v2, %s2800_s5 }
 0x218   : > { %1655 = vrot.lane.b32.xlu0 %v2502_v32, %s2800_s5  ;;  %p2741_p3 = pnand %p2740_p2, %p2734_p13 }
 0x219   : > { %v1066_v34 = vpop.permute.xlu1 %1065 }
 0x21a   : > { %v907_v8 = vpop.permute.xlu0 %906  ;;  %1152 = vst.msk [vmem:[#allocation2 + $0x50] sm:$0xff] %vm1141_vm5, %v1066_v34 }
 0x21b   : > { %976 = vst.msk [vmem:[#allocation2 + $0xd8] sm:$0xff] %vm948_vm4, %v907_v8 }
 0x21d   : > { %v1644_v9 = vpop.permute.xlu1 %1643  ;;  %v1778_v14 = vld [vmem:[#allocation2 + $0xc0] sm:$0xff] }
 0x21e   : > { %v1098_v10 = vpop.permute.xlu0 %1097  ;;  %v1762_v11 = vld [vmem:[#allocation2 + $0x40] sm:$0xff]  ;;  %1731 = vst.msk [vmem:[#allocation2 + $0x48] sm:$0xff] %vm1721_vm8, %v1644_v9  ;;  %2652 = vmatprep.mubr.msk.f32.mxu1 %vm1795_vm9, %v1778_v14 }
 0x21f   : > { %1168 = vst.msk [vmem:[#allocation2 + $0xd0] sm:$0xff] %vm1141_vm5, %v1098_v10  ;;  %2628 = vmatprep.mubr.msk.f32.mxu0 %vm1795_vm9, %v1762_v11 }
 0x221   : > { %v1068_v15 = vpop.permute.xlu1 %1067 }
 0x222   : > { %v1676_v21 = vpop.permute.xlu0 %1675  ;;  %1153 = vst.msk [vmem:[#allocation2 + $0x58] sm:$0xff] %vm1141_vm5, %v1068_v15 }
 0x223   : > { %1747 = vst.msk [vmem:[#allocation2 + $0xc8] sm:$0xff] %vm1721_vm8, %v1676_v21 }
 0x225   : > { %v1260_v43 = vpop.permute.xlu1 %1259  ;;  %v1763_v53 = vld [vmem:[#allocation2 + $0x48] sm:$0xff] }
 0x226   : > { %v1100_v42 = vpop.permute.xlu0 %1099  ;;  %1346 = vst.msk [vmem:[#allocation2 + $0x50] sm:$0xff] %vm1335_vm6, %v1260_v43  ;;  %2629 = vmatmul.mubr.msk.f32.gmra.mxu0 %vm1795_vm9, %v1763_v53 }
 0x227   : > { %1169 = vst.msk [vmem:[#allocation2 + $0xd8] sm:$0xff] %vm1141_vm5, %v1100_v42 }
 0x229   : > { %v1262_v25 = vpop.permute.xlu1 %1261 }
 0x22a   : > { %v1292_v17 = vpop.permute.xlu0 %1291  ;;  %v1779_v13 = vld [vmem:[#allocation2 + $0xc8] sm:$0xff]  ;;  %1347 = vst.msk [vmem:[#allocation2 + $0x58] sm:$0xff] %vm1335_vm6, %v1262_v25 }
 0x22b   : > { %1362 = vst.msk [vmem:[#allocation2 + $0xd0] sm:$0xff] %vm1335_vm6, %v1292_v17  ;;  %2653 = vmatmul.mubr.msk.f32.gmra.mxu1 %vm1795_vm9, %v1779_v13 }
 0x22d   : > { %v1453_v24 = vpop.permute.xlu1 %1452 }
 0x22e   : > { %v1294_v52 = vpop.permute.xlu0 %1293  ;;  %1539 = vst.msk [vmem:[#allocation2 + $0x50] sm:$0xff] %vm1528_vm7, %v1453_v24 }
 0x22f   : > { %1363 = vst.msk [vmem:[#allocation2 + $0xd8] sm:$0xff] %vm1335_vm6, %v1294_v52 }
 0x231   : > { %v909_v20 = vpop.permute.xlu1 %908 }
 0x232   : > { %v1485_v58 = vpop.permute.xlu0 %1484  ;;  %977 = vst.msk [vmem:[#allocation2 + $0xe0] sm:$0xff] %vm948_vm4, %v909_v20 }
 0x233   : > { %1555 = vst.msk [vmem:[#allocation2 + $0xd0] sm:$0xff] %vm1528_vm7, %v1485_v58 }
 0x235   : > { %v1487_v45 = vpop.permute.xlu1 %1486 }
 0x236   : > { %v1455_v59 = vpop.permute.xlu0 %1454  ;;  %1556 = vst.msk [vmem:[#allocation2 + $0xd8] sm:$0xff] %vm1528_vm7, %v1487_v45 }
 0x237   : > { %1540 = vst.msk [vmem:[#allocation2 + $0x58] sm:$0xff] %vm1528_vm7, %v1455_v59 }
 0x239   : > { %v1678_v19 = vpop.permute.xlu1 %1677 }
 0x23a   : > { %v1646_v39 = vpop.permute.xlu0 %1645  ;;  %1748 = vst.msk [vmem:[#allocation2 + $0xd0] sm:$0xff] %vm1721_vm8, %v1678_v19 }
 0x23b   : > { %1732 = vst.msk [vmem:[#allocation2 + $0x50] sm:$0xff] %vm1721_vm8, %v1646_v39 }
 0x23d   : > { %v911_v44 = vpop.permute.xlu1 %910 }
 0x23e   : > { %v879_v35 = vpop.permute.xlu0 %878  ;;  %978 = vst.msk [vmem:[#allocation2 + $0xe8] sm:$0xff] %vm948_vm4, %v911_v44 }
 0x23f   : > { %962 = vst.msk [vmem:[#allocation2 + $0x68] sm:$0xff] %vm948_vm4, %v879_v35 }
 0x241   : > { %v1102_v36 = vpop.permute.xlu1 %1101  ;;  %v1780_v37 = vld [vmem:[#allocation2 + $0xd0] sm:$0xff] }
 0x242   : > { %v1070_v5 = vpop.permute.xlu0 %1069  ;;  %v1764_v38 = vld [vmem:[#allocation2 + $0x50] sm:$0xff]  ;;  %1170 = vst.msk [vmem:[#allocation2 + $0xe0] sm:$0xff] %vm1141_vm5, %v1102_v36  ;;  %2655 = vmatprep.mubr.msk.f32.mxu1 %vm1795_vm9, %v1780_v37 }
 0x243   : > { %1154 = vst.msk [vmem:[#allocation2 + $0x60] sm:$0xff] %vm1141_vm5, %v1070_v5  ;;  %2631 = vmatprep.mubr.msk.f32.mxu0 %vm1795_vm9, %v1764_v38 }
 0x245   : > { %v1680_v47 = vpop.permute.xlu1 %1679 }
 0x246   : > { %v1648_v62 = vpop.permute.xlu0 %1647  ;;  %1749 = vst.msk [vmem:[#allocation2 + $0xd8] sm:$0xff] %vm1721_vm8, %v1680_v47 }
 0x247   : > { %1733 = vst.msk [vmem:[#allocation2 + $0x58] sm:$0xff] %vm1721_vm8, %v1648_v62 }
 0x249   : > { %v1104_v3 = vpop.permute.xlu1 %1103 }
 0x24a   : > { %v1072_v12 = vpop.permute.xlu0 %1071  ;;  %1171 = vst.msk [vmem:[#allocation2 + $0xe8] sm:$0xff] %vm1141_vm5, %v1104_v3 }
 0x24b   : > { %1155 = vst.msk [vmem:[#allocation2 + $0x68] sm:$0xff] %vm1141_vm5, %v1072_v12 }
 0x24d   : > { %v1296_v4 = vpop.permute.xlu1 %1295  ;;  %v1781_v1 = vld [vmem:[#allocation2 + $0xd8] sm:$0xff] }
 0x24e   : > { %v1264_v16 = vpop.permute.xlu0 %1263  ;;  %v1765_v55 = vld [vmem:[#allocation2 + $0x58] sm:$0xff]  ;;  %1364 = vst.msk [vmem:[#allocation2 + $0xe0] sm:$0xff] %vm1335_vm6, %v1296_v4  ;;  %2656 = vmatmul.mubr.msk.f32.gmra.mxu1 %vm1795_vm9, %v1781_v1 }
 0x24f   : > { %1348 = vst.msk [vmem:[#allocation2 + $0x60] sm:$0xff] %vm1335_vm6, %v1264_v16  ;;  %2632 = vmatmul.mubr.msk.f32.gmra.mxu0 %vm1795_vm9, %v1765_v55 }
 0x251   : > { %v1298_v54 = vpop.permute.xlu1 %1297 }
 0x252   : > { %v1266_v50 = vpop.permute.xlu0 %1265  ;;  %1365 = vst.msk [vmem:[#allocation2 + $0xe8] sm:$0xff] %vm1335_vm6, %v1298_v54 }
 0x253   : > { %1349 = vst.msk [vmem:[#allocation2 + $0x68] sm:$0xff] %vm1335_vm6, %v1266_v50 }
 0x255   : > { %v1489_v29 = vpop.permute.xlu1 %1488 }
 0x256   : > { %v1457_v27 = vpop.permute.xlu0 %1456  ;;  %1557 = vst.msk [vmem:[#allocation2 + $0xe0] sm:$0xff] %vm1528_vm7, %v1489_v29  ;;  %v2618_v46 = vpop.f32.mrf.mxu0 }
 0x257   : > { %1541 = vst.msk [vmem:[#allocation2 + $0x60] sm:$0xff] %vm1528_vm7, %v1457_v27  ;;  %2118 = vst [vmem:[%s3887_s30 + $0x8] sm:$0xff] %v2618_v46 }
 0x258   : > { %v1958_v30 = vpop.f32.mrf.mxu0 }
 0x259   : > { %2117 = vst [vmem:[%s3887_s30] sm:$0xff] %v1958_v30  ;;  %v913_v26 = vpop.permute.xlu1 %912 }
 0x25a   : > { %v881_v49 = vpop.permute.xlu0 %880  ;;  %979 = vst.msk [vmem:[#allocation2 + $0xf0] sm:$0xff] %vm948_vm4, %v913_v26 }
 0x25b   : > { %963 = vst.msk [vmem:[#allocation2 + $0x70] sm:$0xff] %vm948_vm4, %v881_v49  ;;  %v2642_v63 = vpop.f32.mrf.mxu1 }
 0x25c   : > { %2134 = vst [vmem:[%s3887_s30 + $0x88] sm:$0xff] %v2642_v63 }
 0x25d   : > { %v2038_v51 = vpop.f32.mrf.mxu1  ;;  %v1491_v61 = vpop.permute.xlu1 %1490 }
 0x25e   : > { %2133 = vst [vmem:[%s3887_s30 + $0x80] sm:$0xff] %v2038_v51  ;;  %v1459_v60 = vpop.permute.xlu0 %1458  ;;  %1558 = vst.msk [vmem:[#allocation2 + $0xe8] sm:$0xff] %vm1528_vm7, %v1491_v61 }
 0x25f   : > { %1542 = vst.msk [vmem:[#allocation2 + $0x68] sm:$0xff] %vm1528_vm7, %v1459_v60 }
 0x261   : > { %v1682_v48 = vpop.permute.xlu1 %1681 }
 0x262   : > { %v1650_v18 = vpop.permute.xlu0 %1649  ;;  %1750 = vst.msk [vmem:[#allocation2 + $0xe0] sm:$0xff] %vm1721_vm8, %v1682_v48 }
 0x263   : > { %1734 = vst.msk [vmem:[#allocation2 + $0x60] sm:$0xff] %vm1721_vm8, %v1650_v18 }
 0x265   : > { %v915_v56 = vpop.permute.xlu1 %914 }
 0x266   : > { %v883_v23 = vpop.permute.xlu0 %882  ;;  %980 = vst.msk [vmem:[#allocation2 + $0xf8] sm:$0xff] %vm948_vm4, %v915_v56 }
 0x267   : > { %964 = vst.msk [vmem:[#allocation2 + $0x78] sm:$0xff] %vm948_vm4, %v883_v23 }
 0x269   : > { %v1106_v57 = vpop.permute.xlu1 %1105  ;;  %v1782_v28 = vld [vmem:[#allocation2 + $0xe0] sm:$0xff] }
 0x26a   : > { %v1074_v22 = vpop.permute.xlu0 %1073  ;;  %v1766_v41 = vld [vmem:[#allocation2 + $0x60] sm:$0xff]  ;;  %1172 = vst.msk [vmem:[#allocation2 + $0xf0] sm:$0xff] %vm1141_vm5, %v1106_v57  ;;  %2658 = vmatprep.mubr.msk.f32.mxu1 %vm1795_vm9, %v1782_v28 }
 0x26b   : > { %1156 = vst.msk [vmem:[#allocation2 + $0x70] sm:$0xff] %vm1141_vm5, %v1074_v22  ;;  %2634 = vmatprep.mubr.msk.f32.mxu0 %vm1795_vm9, %v1766_v41 }
 0x26d   : > { %v1684_v31 = vpop.permute.xlu1 %1683 }
 0x26e   : > { %v1652_v7 = vpop.permute.xlu0 %1651  ;;  %1751 = vst.msk [vmem:[#allocation2 + $0xe8] sm:$0xff] %vm1721_vm8, %v1684_v31 }
 0x26f   : > { %1735 = vst.msk [vmem:[#allocation2 + $0x68] sm:$0xff] %vm1721_vm8, %v1652_v7 }
 0x271   : > { %v1108_v40 = vpop.permute.xlu1 %1107 }
 0x272   : > { %v1076_v0 = vpop.permute.xlu0 %1075  ;;  %1173 = vst.msk [vmem:[#allocation2 + $0xf8] sm:$0xff] %vm1141_vm5, %v1108_v40 }
 0x273   : > { %1157 = vst.msk [vmem:[#allocation2 + $0x78] sm:$0xff] %vm1141_vm5, %v1076_v0 }
 0x275   : > { %v1300_v2 = vpop.permute.xlu1 %1299  ;;  %v1783_v6 = vld [vmem:[#allocation2 + $0xe8] sm:$0xff] }
 0x276   : > { %v1268_v32 = vpop.permute.xlu0 %1267  ;;  %v1767_v33 = vld [vmem:[#allocation2 + $0x68] sm:$0xff]  ;;  %1366 = vst.msk [vmem:[#allocation2 + $0xf0] sm:$0xff] %vm1335_vm6, %v1300_v2  ;;  %2659 = vmatmul.mubr.msk.f32.gmra.mxu1 %vm1795_vm9, %v1783_v6 }
 0x277   : > { %1350 = vst.msk [vmem:[#allocation2 + $0x70] sm:$0xff] %vm1335_vm6, %v1268_v32  ;;  %2635 = vmatmul.mubr.msk.f32.gmra.mxu0 %vm1795_vm9, %v1767_v33 }
 0x279   : > { %v1302_v34 = vpop.permute.xlu1 %1301 }
 0x27a   : > { %v1270_v8 = vpop.permute.xlu0 %1269  ;;  %1367 = vst.msk [vmem:[#allocation2 + $0xf8] sm:$0xff] %vm1335_vm6, %v1302_v34  ;;  %v2621_v9 = vpop.f32.mrf.mxu0 }
 0x27b   : > { %1351 = vst.msk [vmem:[#allocation2 + $0x78] sm:$0xff] %vm1335_vm6, %v1270_v8  ;;  %2120 = vst [vmem:[%s3887_s30 + $0x18] sm:$0xff] %v2621_v9 }
 0x27c   : > { %v1968_v10 = vpop.f32.mrf.mxu0 }
 0x27d   : > { %2119 = vst [vmem:[%s3887_s30 + $0x10] sm:$0xff] %v1968_v10  ;;  %v1493_v11 = vpop.permute.xlu1 %1492 }
 0x27e   : > { %v1461_v14 = vpop.permute.xlu0 %1460  ;;  %1559 = vst.msk [vmem:[#allocation2 + $0xf0] sm:$0xff] %vm1528_vm7, %v1493_v11 }
 0x27f   : > { %1543 = vst.msk [vmem:[#allocation2 + $0x70] sm:$0xff] %vm1528_vm7, %v1461_v14  ;;  %v2645_v15 = vpop.f32.mrf.mxu1 }
 0x280   : > { %2136 = vst [vmem:[%s3887_s30 + $0x98] sm:$0xff] %v2645_v15 }
 0x281   : > { %v2048_v21 = vpop.f32.mrf.mxu1  ;;  %v1495_v43 = vpop.permute.xlu1 %1494 }
 0x282   : > { %2135 = vst [vmem:[%s3887_s30 + $0x90] sm:$0xff] %v2048_v21  ;;  %v1463_v42 = vpop.permute.xlu0 %1462  ;;  %1560 = vst.msk [vmem:[#allocation2 + $0xf8] sm:$0xff] %vm1528_vm7, %v1495_v43 }
 0x283   : > { %1544 = vst.msk [vmem:[#allocation2 + $0x78] sm:$0xff] %vm1528_vm7, %v1463_v42 }
 0x285   : > { %v1686_v53 = vpop.permute.xlu1 %1685 }
 0x286   : > { %v1654_v25 = vpop.permute.xlu0 %1653  ;;  %1752 = vst.msk [vmem:[#allocation2 + $0xf0] sm:$0xff] %vm1721_vm8, %v1686_v53 }
 0x287   : > { %1736 = vst.msk [vmem:[#allocation2 + $0x70] sm:$0xff] %vm1721_vm8, %v1654_v25 }
 0x289   : > { %v1688_v17 = vpop.permute.xlu1 %1687 }
 0x28a   : > { %v1656_v13 = vpop.permute.xlu0 %1655  ;;  %1753 = vst.msk [vmem:[#allocation2 + $0xf8] sm:$0xff] %vm1721_vm8, %v1688_v17 }
 0x28b   : > { %1737 = vst.msk [vmem:[#allocation2 + $0x78] sm:$0xff] %vm1721_vm8, %v1656_v13 }
 0x28d   : > { %v1784_v52 = vld [vmem:[#allocation2 + $0xf0] sm:$0xff] }
 0x28e   : > { %v1768_v24 = vld [vmem:[#allocation2 + $0x70] sm:$0xff]  ;;  %2661 = vmatprep.mubr.msk.f32.mxu1 %vm1795_vm9, %v1784_v52 }
 0x28f   : > { %2637 = vmatprep.mubr.msk.f32.mxu0 %vm1795_vm9, %v1768_v24 }
 0x291   : > { %v1785_v58 = vld [vmem:[#allocation2 + $0xf8] sm:$0xff] }
 0x292   : > { %v1769_v20 = vld [vmem:[#allocation2 + $0x78] sm:$0xff]  ;;  %2662 = vmatmul.mubr.msk.f32.gmra.mxu1 %vm1795_vm9, %v1785_v58 }
 0x293   : > { %2638 = vmatmul.mubr.msk.f32.gmra.mxu0 %vm1795_vm9, %v1769_v20 }
 0x29e   : > { %v2624_v45 = vpop.f32.mrf.mxu0 }
 0x29f   : > { %2122 = vst [vmem:[%s3887_s30 + $0x28] sm:$0xff] %v2624_v45 }
 0x2a0   : > { %v1978_v59 = vpop.f32.mrf.mxu0 }
 0x2a1   : > { %2121 = vst [vmem:[%s3887_s30 + $0x20] sm:$0xff] %v1978_v59 }
 0x2a3   : > { %v2648_v19 = vpop.f32.mrf.mxu1 }
 0x2a4   : > { %2138 = vst [vmem:[%s3887_s30 + $0xa8] sm:$0xff] %v2648_v19 }
 0x2a5   : > { %v2058_v39 = vpop.f32.mrf.mxu1 }
 0x2a6   : > { %2137 = vst [vmem:[%s3887_s30 + $0xa0] sm:$0xff] %v2058_v39 }
 0x2c2   : > { %v2627_v44 = vpop.f32.mrf.mxu0 }
 0x2c3   : > { %2124 = vst [vmem:[%s3887_s30 + $0x38] sm:$0xff] %v2627_v44 }
 0x2c4   : > { %v1988_v35 = vpop.f32.mrf.mxu0 }
 0x2c5   : > { %2123 = vst [vmem:[%s3887_s30 + $0x30] sm:$0xff] %v1988_v35 }
 0x2c7   : > { %v2651_v36 = vpop.f32.mrf.mxu1 }
 0x2c8   : > { %2140 = vst [vmem:[%s3887_s30 + $0xb8] sm:$0xff] %v2651_v36 }
 0x2c9   : > { %v2068_v5 = vpop.f32.mrf.mxu1 }
 0x2ca   : > { %2139 = vst [vmem:[%s3887_s30 + $0xb0] sm:$0xff] %v2068_v5 }
 0x2e6   : > { %v2630_v38 = vpop.f32.mrf.mxu0 }
 0x2e7   : > { %2126 = vst [vmem:[%s3887_s30 + $0x48] sm:$0xff] %v2630_v38 }
 0x2e8   : > { %v1998_v37 = vpop.f32.mrf.mxu0 }
 0x2e9   : > { %2125 = vst [vmem:[%s3887_s30 + $0x40] sm:$0xff] %v1998_v37 }
 0x2eb   : > { %v2654_v47 = vpop.f32.mrf.mxu1 }
 0x2ec   : > { %2142 = vst [vmem:[%s3887_s30 + $0xc8] sm:$0xff] %v2654_v47 }
 0x2ed   : > { %v2078_v62 = vpop.f32.mrf.mxu1 }
 0x2ee   : > { %2141 = vst [vmem:[%s3887_s30 + $0xc0] sm:$0xff] %v2078_v62 }
 0x30e   : > { %v2657_v12 = vpop.f32.mrf.mxu1 }
 0x30f   : > { %v2633_v3 = vpop.f32.mrf.mxu0  ;;  %2144 = vst [vmem:[%s3887_s30 + $0xd8] sm:$0xff] %v2657_v12 }
 0x310   : > { %2128 = vst [vmem:[%s3887_s30 + $0x58] sm:$0xff] %v2633_v3  ;;  %v2088_v16 = vpop.f32.mrf.mxu1 }
 0x311   : > { %v2008_v4 = vpop.f32.mrf.mxu0  ;;  %2143 = vst [vmem:[%s3887_s30 + $0xd0] sm:$0xff] %v2088_v16 }
 0x312   : > { %2127 = vst [vmem:[%s3887_s30 + $0x50] sm:$0xff] %v2008_v4 }
 0x336   : > { %v2660_v1 = vpop.f32.mrf.mxu1 }
 0x337   : > { %v2636_v55 = vpop.f32.mrf.mxu0  ;;  %2146 = vst [vmem:[%s3887_s30 + $0xe8] sm:$0xff] %v2660_v1 }
 0x338   : > { %2130 = vst [vmem:[%s3887_s30 + $0x68] sm:$0xff] %v2636_v55  ;;  %v2098_v50 = vpop.f32.mrf.mxu1 }
 0x339   : > { %v2018_v54 = vpop.f32.mrf.mxu0  ;;  %2145 = vst [vmem:[%s3887_s30 + $0xe0] sm:$0xff] %v2098_v50 }
 0x33a   : > { %2129 = vst [vmem:[%s3887_s30 + $0x60] sm:$0xff] %v2018_v54 }
 0x352   : > { %v2663_v27 = vpop.f32.mrf.mxu1 }
 0x353   : > { %v2639_v29 = vpop.f32.mrf.mxu0  ;;  %2148 = vst [vmem:[%s3887_s30 + $0xf8] sm:$0xff] %v2663_v27 }
 0x354   : > { %2132 = vst [vmem:[%s3887_s30 + $0x78] sm:$0xff] %v2639_v29  ;;  %v2108_v30 = vpop.f32.mrf.mxu1 }
 0x355   : > { %v2028_v46 = vpop.f32.mrf.mxu0  ;;  %2147 = vst [vmem:[%s3887_s30 + $0xf0] sm:$0xff] %v2108_v30 }
 0x356   : > { %2131 = vst [vmem:[%s3887_s30 + $0x70] sm:$0xff] %v2028_v46 }
 0x357   : > { %2744 = shalt.err (!%p2741_p3)
}
 0x358   : > { %s2745_s4 = scalar_lea.hbm %s3956_s22, 4096  ;;  %s2749_s7 = scalar_lea.hbm %s4009_s2, 8192 }
 0x359   : > { %p2746_p4 = scmp.ne.s32.totalorder %s3956_s22, %s2745_s4  ;;  %p2750_p9 = scmp.lt.s32.totalorder %s3956_s22, %s4009_s2 }
 0x35a   : > { %p2751_p10 = scmp.lt.s32.totalorder %s2749_s7, %s2745_s4 }
 0x35b   : > { %p2747_p7 = pnand %p2746_p4, %p2856_p5 }
 0x35c   : > { %p2752_p11 = por %p2751_p10, %p2750_p9 }
 0x35d   : > { %p2748_p8 = pneg %p2747_p7 }
 0x35f   : > { %p2753_p12 = pnand %p2752_p11, %p2748_p8 }
 0x361   : > { %2756 = shalt.err (!%p2753_p12)
}
 0x362   : > { %s2802_s25 = smov 128  }
 0x363   : > { %2683 = dma.vmem_to_hbm [thread:$0]  (%p2856_p5), %s3960_s8, 4096, %s3956_s22, %s3966_s13, %s2802_s25, %s2802_s25, %s2793_s26  }
 0x364 PF: > { %p2689_p13 = scmp.ge.s32.totalorder %s2791_s12, 2  ;;  %s2178_s29 = sand.u32 1, %s2779_s9  }
 0x365   : > { %s2179_s30 = scalar_lea.sflag [#allocation4], %s2178_s29 }
 0x366   : > { %p2686_p0 = pnand %p2689_p13, %p2860_p6 }
 0x368   : > { %p2687_p1 = pneg %p2686_p0 }
 0x36a   : > { %2774 = dma.done.wait (%p2687_p1), %s2179_s30, 4096  }
 0x36b   : > { %2776 = vsyncadd (%p2687_p1), %s2179_s30, 4294963200  ;;  %p12_p2 = scmp.ge.s32.totalorder %s2843_s15, 4   ;;  %s4044_s9 = smov %s2783_s10 }
 0x36c   : > { %s4045_s10 = smov %s2787_s11  ;;  %s4046_s11 = smov %s2854_s18 }
 0x36d   : > { %s4047_s12 = smov %s2843_s15  ;;  %14 = sbr.rel (!%p12_p2) target bundleno = 3 (0x3), region = 66 }
 0x372   :  { %2184 = vsyncpa [#allocation4], 1 }
 0x373   :  { %2186 = vsyncpa [#allocation4 + $0x1], 1 }

</bundles_post_ra>
